<compile_context>
chip_gen: v7x
topology: tpu7x:2x2x1
jax: 0.10.0
libtpu: 0.0.40
codegen_flags: <defaults>
</compile_context>

<pallas_src>
import math

import jax
import jax.numpy as jnp
from jax import lax
from jax.experimental import pallas as pl
from jax.experimental.pallas import tpu as pltpu

# --- model hyper-parameters (small, consistent with FTPPI defaults scaled down) ---
VOCAB = 20
NUM_SEG = 3
HIDDEN = 32
HEADS = 4
HEAD_DIM = HIDDEN // HEADS
FF = HIDDEN * 4
SEQ = 8
EPS = 1e-6
NEG_INF = -1e9
MAX_BATCH_TILE = 512          # batch rows per grid step (review: 128 -> 512)
VMEM_LIMIT_BYTES = 48 * 1024 * 1024


# ----------------------------- in-kernel helpers -----------------------------
def _layernorm(x, g, b):
    mu = jnp.mean(x, axis=-1, keepdims=True)
    var = jnp.mean((x - mu) ** 2, axis=-1, keepdims=True)
    return (x - mu) * lax.rsqrt(var + EPS) * g + b


def _gelu(x):
    return 0.5 * x * (1.0 + jnp.tanh(math.sqrt(2.0 / math.pi) * (x + 0.044715 * x * x * x)))


# ------------- fused embedding + BERT layer + NSP head kernel -----------------
def ftppi_fused_kernel(ids_ref, seg_ref, kbias_ref,
                       tok_ref, sege_ref, pe_ref,
                       ln1g_ref, ln1b_ref, wqkv_ref, bqkv_ref, wo_ref, bo_ref,
                       ln2g_ref, ln2b_ref, w1_ref, b1_ref, w2_ref, b2_ref,
                       wcw_ref, bcw_ref, nw1_ref, nb1_ref, nw2_ref, nb2_ref,
                       out_ref):
    B, S, _ = ids_ref.shape
    H = HIDDEN

    ids3 = ids_ref[...]                                          # (B, S, 1) int32
    seg3 = seg_ref[...]                                          # (B, S, 1) int32

    # --- fused embedding: one-hot token / segment lookups on the MXU + PE add ---
    oh_tok = (ids3 == lax.broadcasted_iota(jnp.int32, (B, S, VOCAB), 2)).astype(jnp.float32)
    oh_seg = (seg3 == lax.broadcasted_iota(jnp.int32, (B, S, NUM_SEG), 2)).astype(jnp.float32)
    emb = jnp.dot(oh_tok.reshape(B * S, VOCAB), tok_ref[...],
                  preferred_element_type=jnp.float32)
    emb = emb + jnp.dot(oh_seg.reshape(B * S, NUM_SEG), sege_ref[...],
                        preferred_element_type=jnp.float32)
    x = (emb.reshape(B, S, H) + pe_ref[...]).reshape(B * S, H)   # (B*S, H) residual slab

    # --- additive masks, computed / broadcast ONCE (no per-head select chains) ---
    kb = jnp.broadcast_to(kbias_ref[...], (B, S, S))             # key-pad bias (0 / -1e9)
    pool_bias = jnp.where(ids3 > 0, 0.0, NEG_INF)                # (B, S, 1) pooling bias

    # --- sublayer 1: pre-LN multi-head self-attention (fused QKV, folded 1/sqrt(d)) ---
    h = _layernorm(x, ln1g_ref[...], ln1b_ref[...])
    qkv = jnp.dot(h, wqkv_ref[...], preferred_element_type=jnp.float32) + bqkv_ref[...]  # (B*S, 3H)

    ctx_heads = []
    for hd in range(HEADS):
        lo = hd * HEAD_DIM
        qh = qkv[:, lo:lo + HEAD_DIM].reshape(B, S, HEAD_DIM)
        kh = qkv[:, H + lo:H + lo + HEAD_DIM].reshape(B, S, HEAD_DIM)
        vh = qkv[:, 2 * H + lo:2 * H + lo + HEAD_DIM].reshape(B, S, HEAD_DIM)
        s = jnp.einsum('bqd,bkd->bqk', qh, kh,
                       preferred_element_type=jnp.float32) + kb              # (B, S, S)
        s = s - jnp.max(s, axis=-1, keepdims=True)
        p = jnp.exp(s)
        p = p * pl.reciprocal(jnp.sum(p, axis=-1, keepdims=True), approx=True)
        ctx = jnp.einsum('bqk,bkd->bqd', p, vh,
                         preferred_element_type=jnp.float32)                 # (B, S, d)
        ctx_heads.append(ctx.reshape(B * S, HEAD_DIM))
    ctx_all = jnp.concatenate(ctx_heads, axis=-1)                            # (B*S, H)
    x = x + jnp.dot(ctx_all, wo_ref[...], preferred_element_type=jnp.float32) + bo_ref[...]

    # --- sublayer 2: pre-LN position-wise feed-forward (GELU) ---
    h2 = _layernorm(x, ln2g_ref[...], ln2b_ref[...])
    f = _gelu(jnp.dot(h2, w1_ref[...], preferred_element_type=jnp.float32) + b1_ref[...])
    x = x + jnp.dot(f, w2_ref[...], preferred_element_type=jnp.float32) + b2_ref[...]

    # --- NextSentencePrediction head (attention-pooled, per the spec) ---
    x3 = x.reshape(B, S, H)
    aw = jnp.sum(x3 * wcw_ref[...], axis=-1, keepdims=True) + bcw_ref[...]   # (B, S, 1)
    aw = aw + pool_bias
    aw = aw - jnp.max(aw, axis=1, keepdims=True)
    pw = jnp.exp(aw)
    pw = pw * pl.reciprocal(jnp.sum(pw, axis=1, keepdims=True), approx=True)
    pooled = jnp.sum(pw * x3, axis=1)                                        # (B, H)

    hdn = jnp.maximum(
        jnp.dot(pooled, nw1_ref[...], preferred_element_type=jnp.float32) + nb1_ref[...], 0.0)
    logits = jnp.dot(hdn, nw2_ref[...], preferred_element_type=jnp.float32) + nb2_ref[...]  # (B, 2)
    z = logits - jnp.max(logits, axis=-1, keepdims=True)
    out_ref[...] = z - jnp.log(jnp.sum(jnp.exp(z), axis=-1, keepdims=True))  # log-softmax


# ----------------------------------- glue --------------------------------------
def _full_spec(arr):
    nd = arr.ndim
    return pl.BlockSpec(arr.shape, lambda i, _nd=nd: (0,) * _nd)


def _pick_batch_tile(n, cap=MAX_BATCH_TILE):
    """Fixed-size tile, robust to any N via cdiv grid; >=2 grid steps when N is
    large enough so v7x's two TensorCores both get work."""
    if n <= 8:
        return n
    b = min(cap, -(-n // 2))         # ceil(n/2) -> at least 2 grid steps
    b = -(-b // 8) * 8               # multiple of 8 (sublane tiling of the (N,2) output)
    return min(b, cap)


def ftppi_fused_call(ids3, seg3, key_bias, p):
    N, S, _ = ids3.shape
    B = _pick_batch_tile(N)
    weights = [p["tok_emb"], p["seg_emb"], p["pe"],
               p["ln1_g"], p["ln1_b"], p["wqkv"], p["bqkv"], p["wo"], p["bo"],
               p["ln2_g"], p["ln2_b"], p["w1"], p["b1"], p["w2"], p["b2"],
               p["nsp_wcw"], p["nsp_bcw"], p["nsp_w1"], p["nsp_b1"],
               p["nsp_w2"], p["nsp_b2"]]
    in_specs = ([pl.BlockSpec((B, S, 1), lambda i: (i, 0, 0)),
                 pl.BlockSpec((B, S, 1), lambda i: (i, 0, 0)),
                 pl.BlockSpec((B, 1, S), lambda i: (i, 0, 0))]
                + [_full_spec(w) for w in weights])
    return pl.pallas_call(
        ftppi_fused_kernel,
        out_shape=jax.ShapeDtypeStruct((N, 2), jnp.float32),
        grid=(pl.cdiv(N, B),),
        in_specs=in_specs,
        out_specs=pl.BlockSpec((B, 2), lambda i: (i, 0)),
        compiler_params=pltpu.CompilerParams(
            dimension_semantics=("parallel",),
            vmem_limit_bytes=VMEM_LIMIT_BYTES),
    )(ids3, seg3, key_bias, *weights)


def sinusoidal_pe(S, H):
    pos = jnp.arange(S, dtype=jnp.float32)[:, None]
    i = jnp.arange(0, H, 2, dtype=jnp.float32)
    div = jnp.exp(-(math.log(10000.0)) * i / H)
    pe = jnp.zeros((S, H), jnp.float32)
    pe = pe.at[:, 0::2].set(jnp.sin(pos * div))
    pe = pe.at[:, 1::2].set(jnp.cos(pos * div))
    return pe


def init_params(key):
    ks = jax.random.split(key, 16)

    def nrm(k, shape):
        return (0.02 * jax.random.normal(k, shape)).astype(jnp.float32)

    # fused QKV projection with the 1/sqrt(head_dim) attention scale folded into
    # the Q columns (and, for generality, the Q third of the bias).
    scale = 1.0 / math.sqrt(HEAD_DIM)
    wq = nrm(ks[2], (HIDDEN, HIDDEN))
    wk = nrm(ks[3], (HIDDEN, HIDDEN))
    wv = nrm(ks[4], (HIDDEN, HIDDEN))
    bq = jnp.zeros((1, HIDDEN), jnp.float32)
    bk = jnp.zeros((1, HIDDEN), jnp.float32)
    bv = jnp.zeros((1, HIDDEN), jnp.float32)
    wqkv = jnp.concatenate([wq * scale, wk, wv], axis=1)          # (H, 3H)
    bqkv = jnp.concatenate([bq * scale, bk, bv], axis=1)          # (1, 3H)

    return {
        # embeddings (fused into the kernel)
        "tok_emb": nrm(ks[0], (VOCAB, HIDDEN)).at[0].set(0.0),    # padding_idx = 0
        "seg_emb": nrm(ks[1], (NUM_SEG, HIDDEN)).at[0].set(0.0),
        "pe": sinusoidal_pe(SEQ, HIDDEN),
        # encoder layer
        "ln1_g": jnp.ones((1, HIDDEN), jnp.float32),
        "ln1_b": jnp.zeros((1, HIDDEN), jnp.float32),
        "wqkv": wqkv, "bqkv": bqkv,
        "wo": nrm(ks[5], (HIDDEN, HIDDEN)), "bo": jnp.zeros((1, HIDDEN), jnp.float32),
        "ln2_g": jnp.ones((1, HIDDEN), jnp.float32),
        "ln2_b": jnp.zeros((1, HIDDEN), jnp.float32),
        "w1": nrm(ks[6], (HIDDEN, FF)), "b1": jnp.zeros((1, FF), jnp.float32),
        "w2": nrm(ks[7], (FF, HIDDEN)), "b2": jnp.zeros((1, HIDDEN), jnp.float32),
        # NextSentencePrediction head
        "nsp_wcw": nrm(ks[8], (1, 1, HIDDEN)), "nsp_bcw": nrm(ks[9], (1, 1, 1)),
        "nsp_w1": nrm(ks[10], (HIDDEN, HIDDEN)), "nsp_b1": nrm(ks[11], (1, HIDDEN)),
        "nsp_w2": nrm(ks[12], (HIDDEN, 2)), "nsp_b2": nrm(ks[13], (1, 2)),
    }


def ftppi_forward(x_ids, params, segment_label=None):
    """x_ids: (N, S) int32 token ids -> (N, 2) log-probabilities."""
    x_ids = x_ids.astype(jnp.int32)
    seg = segment_label.astype(jnp.int32) if segment_label is not None else jnp.zeros_like(x_ids)
    ids3 = x_ids[:, :, None]                                        # (N, S, 1)
    seg3 = seg[:, :, None]                                          # (N, S, 1)
    # additive key-pad bias, hoisted all the way to the wrapper (tiny int/f32 streams
    # are the only HBM inputs besides the ids; the (N,S,H) activation round trip is gone)
    key_bias = jnp.where(x_ids > 0, 0.0, NEG_INF).astype(jnp.float32)[:, None, :]  # (N, 1, S)
    # n_layers = 1 (FTPPI default): single fused embedding + encoder-layer + NSP kernel.
    return ftppi_fused_call(ids3, seg3, key_bias, params)


if __name__ == "__main__":
    key = jax.random.PRNGKey(0)
    pkey, dkey = jax.random.split(key)
    params = init_params(pkey)

    # batch=2, seq=8 token ids; make some pad tokens (0) to exercise masking.
    x_ids = jax.random.randint(dkey, (2, SEQ), 1, VOCAB).astype(jnp.int32)
    x_ids = x_ids.at[1, -2:].set(0)

    out = jax.jit(lambda ids: ftppi_forward(ids, params))(x_ids)
    out = jax.block_until_ready(out)

    assert out.shape == (2, 2)
    assert bool(jnp.all(jnp.isfinite(out)))
    # rows of exp(log_softmax) must sum to 1
    assert bool(jnp.allclose(jnp.exp(out).sum(-1), 1.0, atol=1e-5))
    print("KERNEL_OK")
</pallas_src>

<mosaic_0001>
module attributes {stable_mosaic.version = 11 : i64} {
  func.func @ftppi_fused_kernel(%arg0: i32, %arg1: memref<2x8x1xi32, #tpu.memory_space<vmem>>, %arg2: memref<2x8x1xi32, #tpu.memory_space<vmem>>, %arg3: memref<2x1x8xf32, #tpu.memory_space<vmem>>, %arg4: memref<20x32xf32, #tpu.memory_space<vmem>>, %arg5: memref<3x32xf32, #tpu.memory_space<vmem>>, %arg6: memref<8x32xf32, #tpu.memory_space<vmem>>, %arg7: memref<1x32xf32, #tpu.memory_space<vmem>>, %arg8: memref<1x32xf32, #tpu.memory_space<vmem>>, %arg9: memref<32x96xf32, #tpu.memory_space<vmem>>, %arg10: memref<1x96xf32, #tpu.memory_space<vmem>>, %arg11: memref<32x32xf32, #tpu.memory_space<vmem>>, %arg12: memref<1x32xf32, #tpu.memory_space<vmem>>, %arg13: memref<1x32xf32, #tpu.memory_space<vmem>>, %arg14: memref<1x32xf32, #tpu.memory_space<vmem>>, %arg15: memref<32x128xf32, #tpu.memory_space<vmem>>, %arg16: memref<1x128xf32, #tpu.memory_space<vmem>>, %arg17: memref<128x32xf32, #tpu.memory_space<vmem>>, %arg18: memref<1x32xf32, #tpu.memory_space<vmem>>, %arg19: memref<1x1x32xf32, #tpu.memory_space<vmem>>, %arg20: memref<1x1x1xf32, #tpu.memory_space<vmem>>, %arg21: memref<32x32xf32, #tpu.memory_space<vmem>>, %arg22: memref<1x32xf32, #tpu.memory_space<vmem>>, %arg23: memref<32x2xf32, #tpu.memory_space<vmem>>, %arg24: memref<1x2xf32, #tpu.memory_space<vmem>>, %arg25: memref<2x2xf32, #tpu.memory_space<vmem>>) attributes {dimension_semantics = [#tpu.dimension_semantics<parallel>], iteration_bounds = array<i64: 1>, scalar_prefetch = 0 : i64, scratch_operands = 0 : i64, tpu.core_type = #tpu.core_type<tc>, window_params = [{transform_indices = @transform_0, window_bounds = array<i64: 2, 8, 1>}, {transform_indices = @transform_1, window_bounds = array<i64: 2, 8, 1>}, {transform_indices = @transform_2, window_bounds = array<i64: 2, 1, 8>}, {pipeline_mode = #tpu.pipeline_mode<synchronous>, transform_indices = @transform_3, window_bounds = array<i64: 20, 32>}, {pipeline_mode = #tpu.pipeline_mode<synchronous>, transform_indices = @transform_4, window_bounds = array<i64: 3, 32>}, {pipeline_mode = #tpu.pipeline_mode<synchronous>, transform_indices = @transform_5, window_bounds = array<i64: 8, 32>}, {pipeline_mode = #tpu.pipeline_mode<synchronous>, transform_indices = @transform_6, window_bounds = array<i64: 1, 32>}, {pipeline_mode = #tpu.pipeline_mode<synchronous>, transform_indices = @transform_7, window_bounds = array<i64: 1, 32>}, {pipeline_mode = #tpu.pipeline_mode<synchronous>, transform_indices = @transform_8, window_bounds = array<i64: 32, 96>}, {pipeline_mode = #tpu.pipeline_mode<synchronous>, transform_indices = @transform_9, window_bounds = array<i64: 1, 96>}, {pipeline_mode = #tpu.pipeline_mode<synchronous>, transform_indices = @transform_10, window_bounds = array<i64: 32, 32>}, {pipeline_mode = #tpu.pipeline_mode<synchronous>, transform_indices = @transform_11, window_bounds = array<i64: 1, 32>}, {pipeline_mode = #tpu.pipeline_mode<synchronous>, transform_indices = @transform_12, window_bounds = array<i64: 1, 32>}, {pipeline_mode = #tpu.pipeline_mode<synchronous>, transform_indices = @transform_13, window_bounds = array<i64: 1, 32>}, {pipeline_mode = #tpu.pipeline_mode<synchronous>, transform_indices = @transform_14, window_bounds = array<i64: 32, 128>}, {pipeline_mode = #tpu.pipeline_mode<synchronous>, transform_indices = @transform_15, window_bounds = array<i64: 1, 128>}, {pipeline_mode = #tpu.pipeline_mode<synchronous>, transform_indices = @transform_16, window_bounds = array<i64: 128, 32>}, {pipeline_mode = #tpu.pipeline_mode<synchronous>, transform_indices = @transform_17, window_bounds = array<i64: 1, 32>}, {pipeline_mode = #tpu.pipeline_mode<synchronous>, transform_indices = @transform_18, window_bounds = array<i64: 1, 1, 32>}, {pipeline_mode = #tpu.pipeline_mode<synchronous>, transform_indices = @transform_19, window_bounds = array<i64: 1, 1, 1>}, {pipeline_mode = #tpu.pipeline_mode<synchronous>, transform_indices = @transform_20, window_bounds = array<i64: 32, 32>}, {pipeline_mode = #tpu.pipeline_mode<synchronous>, transform_indices = @transform_21, window_bounds = array<i64: 1, 32>}, {pipeline_mode = #tpu.pipeline_mode<synchronous>, transform_indices = @transform_22, window_bounds = array<i64: 32, 2>}, {pipeline_mode = #tpu.pipeline_mode<synchronous>, transform_indices = @transform_23, window_bounds = array<i64: 1, 2>}, {transform_indices = @transform_24, window_bounds = array<i64: 2, 2>}]} {
    %c0 = arith.constant 0 : index
    %c0_0 = arith.constant 0 : index
    %c0_1 = arith.constant 0 : index
    %0 = vector.load %arg1[%c0, %c0_0, %c0_1] : memref<2x8x1xi32, #tpu.memory_space<vmem>>, vector<2x8x1xi32>
    %c0_2 = arith.constant 0 : index
    %c0_3 = arith.constant 0 : index
    %c0_4 = arith.constant 0 : index
    %1 = vector.load %arg2[%c0_2, %c0_3, %c0_4] : memref<2x8x1xi32, #tpu.memory_space<vmem>>, vector<2x8x1xi32>
    %2 = tpu.iota {dimensions = array<i32: 2>} : vector<2x8x20xi32>
    %3 = vector.broadcast %0 : vector<2x8x1xi32> to vector<2x8x20xi32>
    %4 = arith.cmpi eq, %3, %2 : vector<2x8x20xi32>
    %5 = arith.extui %4 : vector<2x8x20xi1> to vector<2x8x20xi32>
    %6 = arith.sitofp %5 : vector<2x8x20xi32> to vector<2x8x20xf32>
    %7 = tpu.iota {dimensions = array<i32: 2>} : vector<2x8x3xi32>
    %8 = vector.broadcast %1 : vector<2x8x1xi32> to vector<2x8x3xi32>
    %9 = arith.cmpi eq, %8, %7 : vector<2x8x3xi32>
    %10 = arith.extui %9 : vector<2x8x3xi1> to vector<2x8x3xi32>
    %11 = arith.sitofp %10 : vector<2x8x3xi32> to vector<2x8x3xf32>
    %12 = vector.shape_cast %6 : vector<2x8x20xf32> to vector<16x20xf32>
    %c0_5 = arith.constant 0 : index
    %c0_6 = arith.constant 0 : index
    %13 = vector.load %arg4[%c0_5, %c0_6] : memref<20x32xf32, #tpu.memory_space<vmem>>, vector<20x32xf32>
    %cst = arith.constant dense<0.000000e+00> : vector<16x32xf32>
    %14 = tpu.matmul %12, %13, %cst {dimension_numbers = #tpu.dot_dimension_numbers<[1], [0], [0], [1], [0, 0, 1, 1], [], []>} : vector<16x20xf32>, vector<20x32xf32>, vector<16x32xf32> -> vector<16x32xf32>
    %15 = vector.shape_cast %11 : vector<2x8x3xf32> to vector<16x3xf32>
    %c0_7 = arith.constant 0 : index
    %c0_8 = arith.constant 0 : index
    %16 = vector.load %arg5[%c0_7, %c0_8] : memref<3x32xf32, #tpu.memory_space<vmem>>, vector<3x32xf32>
    %cst_9 = arith.constant dense<0.000000e+00> : vector<16x32xf32>
    %17 = tpu.matmul %15, %16, %cst_9 {dimension_numbers = #tpu.dot_dimension_numbers<[1], [0], [0], [1], [0, 0, 1, 1], [], []>} : vector<16x3xf32>, vector<3x32xf32>, vector<16x32xf32> -> vector<16x32xf32>
    %18 = arith.addf %14, %17 : vector<16x32xf32>
    %19 = vector.shape_cast %18 : vector<16x32xf32> to vector<2x8x32xf32>
    %c0_10 = arith.constant 0 : index
    %c0_11 = arith.constant 0 : index
    %20 = vector.load %arg6[%c0_10, %c0_11] : memref<8x32xf32, #tpu.memory_space<vmem>>, vector<8x32xf32>
    %21 = vector.shape_cast %20 : vector<8x32xf32> to vector<1x8x32xf32>
    %22 = vector.broadcast %21 : vector<1x8x32xf32> to vector<2x8x32xf32>
    %23 = arith.addf %19, %22 : vector<2x8x32xf32>
    %24 = vector.shape_cast %23 : vector<2x8x32xf32> to vector<16x32xf32>
    %c0_12 = arith.constant 0 : index
    %c0_13 = arith.constant 0 : index
    %c0_14 = arith.constant 0 : index
    %25 = vector.load %arg3[%c0_12, %c0_13, %c0_14] : memref<2x1x8xf32, #tpu.memory_space<vmem>>, vector<2x1x8xf32>
    %26 = vector.shape_cast %25 : vector<2x1x8xf32> to vector<2x1x8xf32>
    %27 = vector.broadcast %26 : vector<2x1x8xf32> to vector<2x8x8xf32>
    %c0_i32 = arith.constant 0 : i32
    %28 = vector.broadcast %c0_i32 : i32 to vector<2x8x1xi32>
    %29 = arith.cmpi sgt, %0, %28 : vector<2x8x1xi32>
    %cst_15 = arith.constant 0.000000e+00 : f32
    %cst_16 = arith.constant -1.000000e+09 : f32
    %30 = vector.broadcast %cst_15 : f32 to vector<2x8x1xf32>
    %31 = vector.broadcast %cst_16 : f32 to vector<2x8x1xf32>
    %32 = arith.select %29, %30, %31 : vector<2x8x1xi1>, vector<2x8x1xf32>
    %c0_17 = arith.constant 0 : index
    %c0_18 = arith.constant 0 : index
    %33 = vector.load %arg7[%c0_17, %c0_18] : memref<1x32xf32, #tpu.memory_space<vmem>>, vector<1x32xf32>
    %c0_19 = arith.constant 0 : index
    %c0_20 = arith.constant 0 : index
    %34 = vector.load %arg8[%c0_19, %c0_20] : memref<1x32xf32, #tpu.memory_space<vmem>>, vector<1x32xf32>
    %cst_21 = arith.constant dense<0.000000e+00> : vector<16xf32>
    %35 = vector.multi_reduction <add>, %24, %cst_21 [1] : vector<16x32xf32> to vector<16xf32>
    %36 = vector.shape_cast %35 : vector<16xf32> to vector<16x1xf32>
    %cst_22 = arith.constant 3.200000e+01 : f32
    %37 = vector.broadcast %cst_22 : f32 to vector<16x1xf32>
    %38 = arith.divf %36, %37 : vector<16x1xf32>
    %39 = vector.broadcast %38 : vector<16x1xf32> to vector<16x32xf32>
    %40 = arith.subf %24, %39 : vector<16x32xf32>
    %41 = arith.mulf %40, %40 : vector<16x32xf32>
    %cst_23 = arith.constant dense<0.000000e+00> : vector<16xf32>
    %42 = vector.multi_reduction <add>, %41, %cst_23 [1] : vector<16x32xf32> to vector<16xf32>
    %43 = vector.shape_cast %42 : vector<16xf32> to vector<16x1xf32>
    %cst_24 = arith.constant 3.200000e+01 : f32
    %44 = vector.broadcast %cst_24 : f32 to vector<16x1xf32>
    %45 = arith.divf %43, %44 : vector<16x1xf32>
    %46 = vector.broadcast %38 : vector<16x1xf32> to vector<16x32xf32>
    %47 = arith.subf %24, %46 : vector<16x32xf32>
    %cst_25 = arith.constant 9.99999997E-7 : f32
    %48 = vector.broadcast %cst_25 : f32 to vector<16x1xf32>
    %49 = arith.addf %45, %48 : vector<16x1xf32>
    %50 = math.rsqrt %49 : vector<16x1xf32>
    %51 = vector.broadcast %50 : vector<16x1xf32> to vector<16x32xf32>
    %52 = arith.mulf %47, %51 : vector<16x32xf32>
    %53 = vector.broadcast %33 : vector<1x32xf32> to vector<16x32xf32>
    %54 = arith.mulf %52, %53 : vector<16x32xf32>
    %55 = vector.broadcast %34 : vector<1x32xf32> to vector<16x32xf32>
    %56 = arith.addf %54, %55 : vector<16x32xf32>
    %c0_26 = arith.constant 0 : index
    %c0_27 = arith.constant 0 : index
    %57 = vector.load %arg9[%c0_26, %c0_27] : memref<32x96xf32, #tpu.memory_space<vmem>>, vector<32x96xf32>
    %cst_28 = arith.constant dense<0.000000e+00> : vector<16x96xf32>
    %58 = tpu.matmul %56, %57, %cst_28 {dimension_numbers = #tpu.dot_dimension_numbers<[1], [0], [0], [1], [0, 0, 1, 1], [], []>} : vector<16x32xf32>, vector<32x96xf32>, vector<16x96xf32> -> vector<16x96xf32>
    %c0_29 = arith.constant 0 : index
    %c0_30 = arith.constant 0 : index
    %59 = vector.load %arg10[%c0_29, %c0_30] : memref<1x96xf32, #tpu.memory_space<vmem>>, vector<1x96xf32>
    %60 = vector.broadcast %59 : vector<1x96xf32> to vector<16x96xf32>
    %61 = arith.addf %58, %60 : vector<16x96xf32>
    %62 = vector.extract_strided_slice %61 {offsets = [0, 0], sizes = [16, 8], strides = [1, 1]} : vector<16x96xf32> to vector<16x8xf32>
    %63 = vector.shape_cast %62 : vector<16x8xf32> to vector<2x8x8xf32>
    %64 = vector.extract_strided_slice %61 {offsets = [0, 32], sizes = [16, 8], strides = [1, 1]} : vector<16x96xf32> to vector<16x8xf32>
    %65 = vector.shape_cast %64 : vector<16x8xf32> to vector<2x8x8xf32>
    %66 = vector.extract_strided_slice %61 {offsets = [0, 64], sizes = [16, 8], strides = [1, 1]} : vector<16x96xf32> to vector<16x8xf32>
    %67 = vector.shape_cast %66 : vector<16x8xf32> to vector<2x8x8xf32>
    "tpu.trace_start"() <{level = 10 : i32, message = "bqd,bkd->bqk"}> : () -> ()
    %cst_31 = arith.constant dense<0.000000e+00> : vector<2x8x8xf32>
    %68 = tpu.matmul %63, %65, %cst_31 {dimension_numbers = #tpu.dot_dimension_numbers<[2], [2], [1], [1], [0, 0, 0, 1, 1, 1], [0], [0]>} : vector<2x8x8xf32>, vector<2x8x8xf32>, vector<2x8x8xf32> -> vector<2x8x8xf32>
    "tpu.trace_stop"() : () -> ()
    %69 = arith.addf %68, %27 : vector<2x8x8xf32>
    %cst_32 = arith.constant dense<0xFF800000> : vector<2x8xf32>
    %70 = vector.multi_reduction <maximumf>, %69, %cst_32 [2] : vector<2x8x8xf32> to vector<2x8xf32>
    %71 = vector.shape_cast %70 : vector<2x8xf32> to vector<2x8x1xf32>
    %72 = vector.broadcast %71 : vector<2x8x1xf32> to vector<2x8x8xf32>
    %73 = arith.subf %69, %72 : vector<2x8x8xf32>
    %74 = math.exp %73 : vector<2x8x8xf32>
    %cst_33 = arith.constant dense<0.000000e+00> : vector<2x8xf32>
    %75 = vector.multi_reduction <add>, %74, %cst_33 [2] : vector<2x8x8xf32> to vector<2x8xf32>
    %76 = vector.shape_cast %75 : vector<2x8xf32> to vector<2x8x1xf32>
    %77 = tpu.reciprocal %76 {approx = true} : vector<2x8x1xf32> -> vector<2x8x1xf32>
    %78 = vector.broadcast %77 : vector<2x8x1xf32> to vector<2x8x8xf32>
    %79 = arith.mulf %74, %78 : vector<2x8x8xf32>
    "tpu.trace_start"() <{level = 10 : i32, message = "bqk,bkd->bqd"}> : () -> ()
    %cst_34 = arith.constant dense<0.000000e+00> : vector<2x8x8xf32>
    %80 = tpu.matmul %79, %67, %cst_34 {dimension_numbers = #tpu.dot_dimension_numbers<[2], [1], [1], [2], [0, 0, 0, 1, 1, 2], [0], [0]>} : vector<2x8x8xf32>, vector<2x8x8xf32>, vector<2x8x8xf32> -> vector<2x8x8xf32>
    "tpu.trace_stop"() : () -> ()
    %81 = vector.shape_cast %80 : vector<2x8x8xf32> to vector<16x8xf32>
    %82 = vector.extract_strided_slice %61 {offsets = [0, 8], sizes = [16, 8], strides = [1, 1]} : vector<16x96xf32> to vector<16x8xf32>
    %83 = vector.shape_cast %82 : vector<16x8xf32> to vector<2x8x8xf32>
    %84 = vector.extract_strided_slice %61 {offsets = [0, 40], sizes = [16, 8], strides = [1, 1]} : vector<16x96xf32> to vector<16x8xf32>
    %85 = vector.shape_cast %84 : vector<16x8xf32> to vector<2x8x8xf32>
    %86 = vector.extract_strided_slice %61 {offsets = [0, 72], sizes = [16, 8], strides = [1, 1]} : vector<16x96xf32> to vector<16x8xf32>
    %87 = vector.shape_cast %86 : vector<16x8xf32> to vector<2x8x8xf32>
    "tpu.trace_start"() <{level = 10 : i32, message = "bqd,bkd->bqk"}> : () -> ()
    %cst_35 = arith.constant dense<0.000000e+00> : vector<2x8x8xf32>
    %88 = tpu.matmul %83, %85, %cst_35 {dimension_numbers = #tpu.dot_dimension_numbers<[2], [2], [1], [1], [0, 0, 0, 1, 1, 1], [0], [0]>} : vector<2x8x8xf32>, vector<2x8x8xf32>, vector<2x8x8xf32> -> vector<2x8x8xf32>
    "tpu.trace_stop"() : () -> ()
    %89 = arith.addf %88, %27 : vector<2x8x8xf32>
    %cst_36 = arith.constant dense<0xFF800000> : vector<2x8xf32>
    %90 = vector.multi_reduction <maximumf>, %89, %cst_36 [2] : vector<2x8x8xf32> to vector<2x8xf32>
    %91 = vector.shape_cast %90 : vector<2x8xf32> to vector<2x8x1xf32>
    %92 = vector.broadcast %91 : vector<2x8x1xf32> to vector<2x8x8xf32>
    %93 = arith.subf %89, %92 : vector<2x8x8xf32>
    %94 = math.exp %93 : vector<2x8x8xf32>
    %cst_37 = arith.constant dense<0.000000e+00> : vector<2x8xf32>
    %95 = vector.multi_reduction <add>, %94, %cst_37 [2] : vector<2x8x8xf32> to vector<2x8xf32>
    %96 = vector.shape_cast %95 : vector<2x8xf32> to vector<2x8x1xf32>
    %97 = tpu.reciprocal %96 {approx = true} : vector<2x8x1xf32> -> vector<2x8x1xf32>
    %98 = vector.broadcast %97 : vector<2x8x1xf32> to vector<2x8x8xf32>
    %99 = arith.mulf %94, %98 : vector<2x8x8xf32>
    "tpu.trace_start"() <{level = 10 : i32, message = "bqk,bkd->bqd"}> : () -> ()
    %cst_38 = arith.constant dense<0.000000e+00> : vector<2x8x8xf32>
    %100 = tpu.matmul %99, %87, %cst_38 {dimension_numbers = #tpu.dot_dimension_numbers<[2], [1], [1], [2], [0, 0, 0, 1, 1, 2], [0], [0]>} : vector<2x8x8xf32>, vector<2x8x8xf32>, vector<2x8x8xf32> -> vector<2x8x8xf32>
    "tpu.trace_stop"() : () -> ()
    %101 = vector.shape_cast %100 : vector<2x8x8xf32> to vector<16x8xf32>
    %102 = vector.extract_strided_slice %61 {offsets = [0, 16], sizes = [16, 8], strides = [1, 1]} : vector<16x96xf32> to vector<16x8xf32>
    %103 = vector.shape_cast %102 : vector<16x8xf32> to vector<2x8x8xf32>
    %104 = vector.extract_strided_slice %61 {offsets = [0, 48], sizes = [16, 8], strides = [1, 1]} : vector<16x96xf32> to vector<16x8xf32>
    %105 = vector.shape_cast %104 : vector<16x8xf32> to vector<2x8x8xf32>
    %106 = vector.extract_strided_slice %61 {offsets = [0, 80], sizes = [16, 8], strides = [1, 1]} : vector<16x96xf32> to vector<16x8xf32>
    %107 = vector.shape_cast %106 : vector<16x8xf32> to vector<2x8x8xf32>
    "tpu.trace_start"() <{level = 10 : i32, message = "bqd,bkd->bqk"}> : () -> ()
    %cst_39 = arith.constant dense<0.000000e+00> : vector<2x8x8xf32>
    %108 = tpu.matmul %103, %105, %cst_39 {dimension_numbers = #tpu.dot_dimension_numbers<[2], [2], [1], [1], [0, 0, 0, 1, 1, 1], [0], [0]>} : vector<2x8x8xf32>, vector<2x8x8xf32>, vector<2x8x8xf32> -> vector<2x8x8xf32>
    "tpu.trace_stop"() : () -> ()
    %109 = arith.addf %108, %27 : vector<2x8x8xf32>
    %cst_40 = arith.constant dense<0xFF800000> : vector<2x8xf32>
    %110 = vector.multi_reduction <maximumf>, %109, %cst_40 [2] : vector<2x8x8xf32> to vector<2x8xf32>
    %111 = vector.shape_cast %110 : vector<2x8xf32> to vector<2x8x1xf32>
    %112 = vector.broadcast %111 : vector<2x8x1xf32> to vector<2x8x8xf32>
    %113 = arith.subf %109, %112 : vector<2x8x8xf32>
    %114 = math.exp %113 : vector<2x8x8xf32>
    %cst_41 = arith.constant dense<0.000000e+00> : vector<2x8xf32>
    %115 = vector.multi_reduction <add>, %114, %cst_41 [2] : vector<2x8x8xf32> to vector<2x8xf32>
    %116 = vector.shape_cast %115 : vector<2x8xf32> to vector<2x8x1xf32>
    %117 = tpu.reciprocal %116 {approx = true} : vector<2x8x1xf32> -> vector<2x8x1xf32>
    %118 = vector.broadcast %117 : vector<2x8x1xf32> to vector<2x8x8xf32>
    %119 = arith.mulf %114, %118 : vector<2x8x8xf32>
    "tpu.trace_start"() <{level = 10 : i32, message = "bqk,bkd->bqd"}> : () -> ()
    %cst_42 = arith.constant dense<0.000000e+00> : vector<2x8x8xf32>
    %120 = tpu.matmul %119, %107, %cst_42 {dimension_numbers = #tpu.dot_dimension_numbers<[2], [1], [1], [2], [0, 0, 0, 1, 1, 2], [0], [0]>} : vector<2x8x8xf32>, vector<2x8x8xf32>, vector<2x8x8xf32> -> vector<2x8x8xf32>
    "tpu.trace_stop"() : () -> ()
    %121 = vector.shape_cast %120 : vector<2x8x8xf32> to vector<16x8xf32>
    %122 = vector.extract_strided_slice %61 {offsets = [0, 24], sizes = [16, 8], strides = [1, 1]} : vector<16x96xf32> to vector<16x8xf32>
    %123 = vector.shape_cast %122 : vector<16x8xf32> to vector<2x8x8xf32>
    %124 = vector.extract_strided_slice %61 {offsets = [0, 56], sizes = [16, 8], strides = [1, 1]} : vector<16x96xf32> to vector<16x8xf32>
    %125 = vector.shape_cast %124 : vector<16x8xf32> to vector<2x8x8xf32>
    %126 = vector.extract_strided_slice %61 {offsets = [0, 88], sizes = [16, 8], strides = [1, 1]} : vector<16x96xf32> to vector<16x8xf32>
    %127 = vector.shape_cast %126 : vector<16x8xf32> to vector<2x8x8xf32>
    "tpu.trace_start"() <{level = 10 : i32, message = "bqd,bkd->bqk"}> : () -> ()
    %cst_43 = arith.constant dense<0.000000e+00> : vector<2x8x8xf32>
    %128 = tpu.matmul %123, %125, %cst_43 {dimension_numbers = #tpu.dot_dimension_numbers<[2], [2], [1], [1], [0, 0, 0, 1, 1, 1], [0], [0]>} : vector<2x8x8xf32>, vector<2x8x8xf32>, vector<2x8x8xf32> -> vector<2x8x8xf32>
    "tpu.trace_stop"() : () -> ()
    %129 = arith.addf %128, %27 : vector<2x8x8xf32>
    %cst_44 = arith.constant dense<0xFF800000> : vector<2x8xf32>
    %130 = vector.multi_reduction <maximumf>, %129, %cst_44 [2] : vector<2x8x8xf32> to vector<2x8xf32>
    %131 = vector.shape_cast %130 : vector<2x8xf32> to vector<2x8x1xf32>
    %132 = vector.broadcast %131 : vector<2x8x1xf32> to vector<2x8x8xf32>
    %133 = arith.subf %129, %132 : vector<2x8x8xf32>
    %134 = math.exp %133 : vector<2x8x8xf32>
    %cst_45 = arith.constant dense<0.000000e+00> : vector<2x8xf32>
    %135 = vector.multi_reduction <add>, %134, %cst_45 [2] : vector<2x8x8xf32> to vector<2x8xf32>
    %136 = vector.shape_cast %135 : vector<2x8xf32> to vector<2x8x1xf32>
    %137 = tpu.reciprocal %136 {approx = true} : vector<2x8x1xf32> -> vector<2x8x1xf32>
    %138 = vector.broadcast %137 : vector<2x8x1xf32> to vector<2x8x8xf32>
    %139 = arith.mulf %134, %138 : vector<2x8x8xf32>
    "tpu.trace_start"() <{level = 10 : i32, message = "bqk,bkd->bqd"}> : () -> ()
    %cst_46 = arith.constant dense<0.000000e+00> : vector<2x8x8xf32>
    %140 = tpu.matmul %139, %127, %cst_46 {dimension_numbers = #tpu.dot_dimension_numbers<[2], [1], [1], [2], [0, 0, 0, 1, 1, 2], [0], [0]>} : vector<2x8x8xf32>, vector<2x8x8xf32>, vector<2x8x8xf32> -> vector<2x8x8xf32>
    "tpu.trace_stop"() : () -> ()
    %141 = vector.shape_cast %140 : vector<2x8x8xf32> to vector<16x8xf32>
    %142 = tpu.concatenate %81, %101, %121, %141 in 1 : vector<16x8xf32>, vector<16x8xf32>, vector<16x8xf32>, vector<16x8xf32> -> vector<16x32xf32>
    %c0_47 = arith.constant 0 : index
    %c0_48 = arith.constant 0 : index
    %143 = vector.load %arg11[%c0_47, %c0_48] : memref<32x32xf32, #tpu.memory_space<vmem>>, vector<32x32xf32>
    %cst_49 = arith.constant dense<0.000000e+00> : vector<16x32xf32>
    %144 = tpu.matmul %142, %143, %cst_49 {dimension_numbers = #tpu.dot_dimension_numbers<[1], [0], [0], [1], [0, 0, 1, 1], [], []>} : vector<16x32xf32>, vector<32x32xf32>, vector<16x32xf32> -> vector<16x32xf32>
    %145 = arith.addf %24, %144 : vector<16x32xf32>
    %c0_50 = arith.constant 0 : index
    %c0_51 = arith.constant 0 : index
    %146 = vector.load %arg12[%c0_50, %c0_51] : memref<1x32xf32, #tpu.memory_space<vmem>>, vector<1x32xf32>
    %147 = vector.broadcast %146 : vector<1x32xf32> to vector<16x32xf32>
    %148 = arith.addf %145, %147 : vector<16x32xf32>
    %c0_52 = arith.constant 0 : index
    %c0_53 = arith.constant 0 : index
    %149 = vector.load %arg13[%c0_52, %c0_53] : memref<1x32xf32, #tpu.memory_space<vmem>>, vector<1x32xf32>
    %c0_54 = arith.constant 0 : index
    %c0_55 = arith.constant 0 : index
    %150 = vector.load %arg14[%c0_54, %c0_55] : memref<1x32xf32, #tpu.memory_space<vmem>>, vector<1x32xf32>
    %cst_56 = arith.constant dense<0.000000e+00> : vector<16xf32>
    %151 = vector.multi_reduction <add>, %148, %cst_56 [1] : vector<16x32xf32> to vector<16xf32>
    %152 = vector.shape_cast %151 : vector<16xf32> to vector<16x1xf32>
    %cst_57 = arith.constant 3.200000e+01 : f32
    %153 = vector.broadcast %cst_57 : f32 to vector<16x1xf32>
    %154 = arith.divf %152, %153 : vector<16x1xf32>
    %155 = vector.broadcast %154 : vector<16x1xf32> to vector<16x32xf32>
    %156 = arith.subf %148, %155 : vector<16x32xf32>
    %157 = arith.mulf %156, %156 : vector<16x32xf32>
    %cst_58 = arith.constant dense<0.000000e+00> : vector<16xf32>
    %158 = vector.multi_reduction <add>, %157, %cst_58 [1] : vector<16x32xf32> to vector<16xf32>
    %159 = vector.shape_cast %158 : vector<16xf32> to vector<16x1xf32>
    %cst_59 = arith.constant 3.200000e+01 : f32
    %160 = vector.broadcast %cst_59 : f32 to vector<16x1xf32>
    %161 = arith.divf %159, %160 : vector<16x1xf32>
    %162 = vector.broadcast %154 : vector<16x1xf32> to vector<16x32xf32>
    %163 = arith.subf %148, %162 : vector<16x32xf32>
    %cst_60 = arith.constant 9.99999997E-7 : f32
    %164 = vector.broadcast %cst_60 : f32 to vector<16x1xf32>
    %165 = arith.addf %161, %164 : vector<16x1xf32>
    %166 = math.rsqrt %165 : vector<16x1xf32>
    %167 = vector.broadcast %166 : vector<16x1xf32> to vector<16x32xf32>
    %168 = arith.mulf %163, %167 : vector<16x32xf32>
    %169 = vector.broadcast %149 : vector<1x32xf32> to vector<16x32xf32>
    %170 = arith.mulf %168, %169 : vector<16x32xf32>
    %171 = vector.broadcast %150 : vector<1x32xf32> to vector<16x32xf32>
    %172 = arith.addf %170, %171 : vector<16x32xf32>
    %c0_61 = arith.constant 0 : index
    %c0_62 = arith.constant 0 : index
    %173 = vector.load %arg15[%c0_61, %c0_62] : memref<32x128xf32, #tpu.memory_space<vmem>>, vector<32x128xf32>
    %cst_63 = arith.constant dense<0.000000e+00> : vector<16x128xf32>
    %174 = tpu.matmul %172, %173, %cst_63 {dimension_numbers = #tpu.dot_dimension_numbers<[1], [0], [0], [1], [0, 0, 1, 1], [], []>} : vector<16x32xf32>, vector<32x128xf32>, vector<16x128xf32> -> vector<16x128xf32>
    %c0_64 = arith.constant 0 : index
    %c0_65 = arith.constant 0 : index
    %175 = vector.load %arg16[%c0_64, %c0_65] : memref<1x128xf32, #tpu.memory_space<vmem>>, vector<1x128xf32>
    %176 = vector.broadcast %175 : vector<1x128xf32> to vector<16x128xf32>
    %177 = arith.addf %174, %176 : vector<16x128xf32>
    %cst_66 = arith.constant 5.000000e-01 : f32
    %178 = vector.broadcast %cst_66 : f32 to vector<16x128xf32>
    %179 = arith.mulf %178, %177 : vector<16x128xf32>
    %cst_67 = arith.constant 4.471500e-02 : f32
    %180 = vector.broadcast %cst_67 : f32 to vector<16x128xf32>
    %181 = arith.mulf %180, %177 : vector<16x128xf32>
    %182 = arith.mulf %181, %177 : vector<16x128xf32>
    %183 = arith.mulf %182, %177 : vector<16x128xf32>
    %184 = arith.addf %177, %183 : vector<16x128xf32>
    %cst_68 = arith.constant 0.797884583 : f32
    %185 = vector.broadcast %cst_68 : f32 to vector<16x128xf32>
    %186 = arith.mulf %185, %184 : vector<16x128xf32>
    %187 = math.tanh %186 : vector<16x128xf32>
    %cst_69 = arith.constant 1.000000e+00 : f32
    %188 = vector.broadcast %cst_69 : f32 to vector<16x128xf32>
    %189 = arith.addf %188, %187 : vector<16x128xf32>
    %190 = arith.mulf %179, %189 : vector<16x128xf32>
    %c0_70 = arith.constant 0 : index
    %c0_71 = arith.constant 0 : index
    %191 = vector.load %arg17[%c0_70, %c0_71] : memref<128x32xf32, #tpu.memory_space<vmem>>, vector<128x32xf32>
    %cst_72 = arith.constant dense<0.000000e+00> : vector<16x32xf32>
    %192 = tpu.matmul %190, %191, %cst_72 {dimension_numbers = #tpu.dot_dimension_numbers<[1], [0], [0], [1], [0, 0, 1, 1], [], []>} : vector<16x128xf32>, vector<128x32xf32>, vector<16x32xf32> -> vector<16x32xf32>
    %193 = arith.addf %148, %192 : vector<16x32xf32>
    %c0_73 = arith.constant 0 : index
    %c0_74 = arith.constant 0 : index
    %194 = vector.load %arg18[%c0_73, %c0_74] : memref<1x32xf32, #tpu.memory_space<vmem>>, vector<1x32xf32>
    %195 = vector.broadcast %194 : vector<1x32xf32> to vector<16x32xf32>
    %196 = arith.addf %193, %195 : vector<16x32xf32>
    %197 = vector.shape_cast %196 : vector<16x32xf32> to vector<2x8x32xf32>
    %c0_75 = arith.constant 0 : index
    %c0_76 = arith.constant 0 : index
    %c0_77 = arith.constant 0 : index
    %198 = vector.load %arg19[%c0_75, %c0_76, %c0_77] : memref<1x1x32xf32, #tpu.memory_space<vmem>>, vector<1x1x32xf32>
    %199 = vector.broadcast %198 : vector<1x1x32xf32> to vector<2x8x32xf32>
    %200 = arith.mulf %197, %199 : vector<2x8x32xf32>
    %cst_78 = arith.constant dense<0.000000e+00> : vector<2x8xf32>
    %201 = vector.multi_reduction <add>, %200, %cst_78 [2] : vector<2x8x32xf32> to vector<2x8xf32>
    %202 = vector.shape_cast %201 : vector<2x8xf32> to vector<2x8x1xf32>
    %c0_79 = arith.constant 0 : index
    %c0_80 = arith.constant 0 : index
    %c0_81 = arith.constant 0 : index
    %203 = vector.load %arg20[%c0_79, %c0_80, %c0_81] : memref<1x1x1xf32, #tpu.memory_space<vmem>>, vector<1x1x1xf32>
    %204 = vector.broadcast %203 : vector<1x1x1xf32> to vector<2x8x1xf32>
    %205 = arith.addf %202, %204 : vector<2x8x1xf32>
    %206 = arith.addf %205, %32 : vector<2x8x1xf32>
    %cst_82 = arith.constant dense<0xFF800000> : vector<2x1xf32>
    %207 = vector.multi_reduction <maximumf>, %206, %cst_82 [1] : vector<2x8x1xf32> to vector<2x1xf32>
    %208 = vector.shape_cast %207 : vector<2x1xf32> to vector<2x1x1xf32>
    %209 = vector.broadcast %208 : vector<2x1x1xf32> to vector<2x8x1xf32>
    %210 = arith.subf %206, %209 : vector<2x8x1xf32>
    %211 = math.exp %210 : vector<2x8x1xf32>
    %cst_83 = arith.constant dense<0.000000e+00> : vector<2x1xf32>
    %212 = vector.multi_reduction <add>, %211, %cst_83 [1] : vector<2x8x1xf32> to vector<2x1xf32>
    %213 = vector.shape_cast %212 : vector<2x1xf32> to vector<2x1x1xf32>
    %214 = tpu.reciprocal %213 {approx = true} : vector<2x1x1xf32> -> vector<2x1x1xf32>
    %215 = vector.broadcast %214 : vector<2x1x1xf32> to vector<2x8x1xf32>
    %216 = arith.mulf %211, %215 : vector<2x8x1xf32>
    %217 = vector.broadcast %216 : vector<2x8x1xf32> to vector<2x8x32xf32>
    %218 = arith.mulf %217, %197 : vector<2x8x32xf32>
    %cst_84 = arith.constant dense<0.000000e+00> : vector<2x32xf32>
    %219 = vector.multi_reduction <add>, %218, %cst_84 [1] : vector<2x8x32xf32> to vector<2x32xf32>
    %c0_85 = arith.constant 0 : index
    %c0_86 = arith.constant 0 : index
    %220 = vector.load %arg21[%c0_85, %c0_86] : memref<32x32xf32, #tpu.memory_space<vmem>>, vector<32x32xf32>
    %cst_87 = arith.constant dense<0.000000e+00> : vector<2x32xf32>
    %221 = tpu.matmul %219, %220, %cst_87 {dimension_numbers = #tpu.dot_dimension_numbers<[1], [0], [0], [1], [0, 0, 1, 1], [], []>} : vector<2x32xf32>, vector<32x32xf32>, vector<2x32xf32> -> vector<2x32xf32>
    %c0_88 = arith.constant 0 : index
    %c0_89 = arith.constant 0 : index
    %222 = vector.load %arg22[%c0_88, %c0_89] : memref<1x32xf32, #tpu.memory_space<vmem>>, vector<1x32xf32>
    %223 = vector.broadcast %222 : vector<1x32xf32> to vector<2x32xf32>
    %224 = arith.addf %221, %223 : vector<2x32xf32>
    %cst_90 = arith.constant 0.000000e+00 : f32
    %225 = vector.broadcast %cst_90 : f32 to vector<2x32xf32>
    %226 = arith.maximumf %224, %225 : vector<2x32xf32>
    %c0_91 = arith.constant 0 : index
    %c0_92 = arith.constant 0 : index
    %227 = vector.load %arg23[%c0_91, %c0_92] : memref<32x2xf32, #tpu.memory_space<vmem>>, vector<32x2xf32>
    %cst_93 = arith.constant dense<0.000000e+00> : vector<2x2xf32>
    %228 = tpu.matmul %226, %227, %cst_93 {dimension_numbers = #tpu.dot_dimension_numbers<[1], [0], [0], [1], [0, 0, 1, 1], [], []>} : vector<2x32xf32>, vector<32x2xf32>, vector<2x2xf32> -> vector<2x2xf32>
    %c0_94 = arith.constant 0 : index
    %c0_95 = arith.constant 0 : index
    %229 = vector.load %arg24[%c0_94, %c0_95] : memref<1x2xf32, #tpu.memory_space<vmem>>, vector<1x2xf32>
    %230 = vector.broadcast %229 : vector<1x2xf32> to vector<2x2xf32>
    %231 = arith.addf %228, %230 : vector<2x2xf32>
    %cst_96 = arith.constant dense<0xFF800000> : vector<2xf32>
    %232 = vector.multi_reduction <maximumf>, %231, %cst_96 [1] : vector<2x2xf32> to vector<2xf32>
    %233 = vector.shape_cast %232 : vector<2xf32> to vector<2x1xf32>
    %234 = vector.broadcast %233 : vector<2x1xf32> to vector<2x2xf32>
    %235 = arith.subf %231, %234 : vector<2x2xf32>
    %236 = math.exp %235 : vector<2x2xf32>
    %cst_97 = arith.constant dense<0.000000e+00> : vector<2xf32>
    %237 = vector.multi_reduction <add>, %236, %cst_97 [1] : vector<2x2xf32> to vector<2xf32>
    %238 = vector.shape_cast %237 : vector<2xf32> to vector<2x1xf32>
    %239 = math.log %238 : vector<2x1xf32>
    %240 = vector.broadcast %239 : vector<2x1xf32> to vector<2x2xf32>
    %241 = arith.subf %235, %240 : vector<2x2xf32>
    %c0_98 = arith.constant 0 : index
    %c0_99 = arith.constant 0 : index
    %242 = vector.load %arg25[%c0_98, %c0_99] : memref<2x2xf32, #tpu.memory_space<vmem>>, vector<2x2xf32>
    tpu.vector_store %arg25[%c0_98, %c0_99], %241 {strides = array<i32>} : memref<2x2xf32, #tpu.memory_space<vmem>>, vector<2x2xf32>,
    return
  }
  func.func @transform_0(%arg0: i32) -> (i32, i32, i32) {
    %c0_i32 = arith.constant 0 : i32
    %c0_i32_0 = arith.constant 0 : i32
    %c0_i32_1 = arith.constant 0 : i32
    return %arg0, %c0_i32, %c0_i32_0 : i32, i32, i32
  }
  func.func @transform_1(%arg0: i32) -> (i32, i32, i32) {
    %c0_i32 = arith.constant 0 : i32
    %c0_i32_0 = arith.constant 0 : i32
    %c0_i32_1 = arith.constant 0 : i32
    return %arg0, %c0_i32, %c0_i32_0 : i32, i32, i32
  }
  func.func @transform_2(%arg0: i32) -> (i32, i32, i32) {
    %c0_i32 = arith.constant 0 : i32
    %c0_i32_0 = arith.constant 0 : i32
    %c0_i32_1 = arith.constant 0 : i32
    return %arg0, %c0_i32, %c0_i32_0 : i32, i32, i32
  }
  func.func @transform_3(%arg0: i32) -> (i32, i32) {
    %c0_i32 = arith.constant 0 : i32
    %c0_i32_0 = arith.constant 0 : i32
    %c0_i32_1 = arith.constant 0 : i32
    return %c0_i32, %c0_i32_0 : i32, i32
  }
  func.func @transform_4(%arg0: i32) -> (i32, i32) {
    %c0_i32 = arith.constant 0 : i32
    %c0_i32_0 = arith.constant 0 : i32
    %c0_i32_1 = arith.constant 0 : i32
    return %c0_i32, %c0_i32_0 : i32, i32
  }
  func.func @transform_5(%arg0: i32) -> (i32, i32) {
    %c0_i32 = arith.constant 0 : i32
    %c0_i32_0 = arith.constant 0 : i32
    %c0_i32_1 = arith.constant 0 : i32
    return %c0_i32, %c0_i32_0 : i32, i32
  }
  func.func @transform_6(%arg0: i32) -> (i32, i32) {
    %c0_i32 = arith.constant 0 : i32
    %c0_i32_0 = arith.constant 0 : i32
    %c0_i32_1 = arith.constant 0 : i32
    return %c0_i32, %c0_i32_0 : i32, i32
  }
  func.func @transform_7(%arg0: i32) -> (i32, i32) {
    %c0_i32 = arith.constant 0 : i32
    %c0_i32_0 = arith.constant 0 : i32
    %c0_i32_1 = arith.constant 0 : i32
    return %c0_i32, %c0_i32_0 : i32, i32
  }
  func.func @transform_8(%arg0: i32) -> (i32, i32) {
    %c0_i32 = arith.constant 0 : i32
    %c0_i32_0 = arith.constant 0 : i32
    %c0_i32_1 = arith.constant 0 : i32
    return %c0_i32, %c0_i32_0 : i32, i32
  }
  func.func @transform_9(%arg0: i32) -> (i32, i32) {
    %c0_i32 = arith.constant 0 : i32
    %c0_i32_0 = arith.constant 0 : i32
    %c0_i32_1 = arith.constant 0 : i32
    return %c0_i32, %c0_i32_0 : i32, i32
  }
  func.func @transform_10(%arg0: i32) -> (i32, i32) {
    %c0_i32 = arith.constant 0 : i32
    %c0_i32_0 = arith.constant 0 : i32
    %c0_i32_1 = arith.constant 0 : i32
    return %c0_i32, %c0_i32_0 : i32, i32
  }
  func.func @transform_11(%arg0: i32) -> (i32, i32) {
    %c0_i32 = arith.constant 0 : i32
    %c0_i32_0 = arith.constant 0 : i32
    %c0_i32_1 = arith.constant 0 : i32
    return %c0_i32, %c0_i32_0 : i32, i32
  }
  func.func @transform_12(%arg0: i32) -> (i32, i32) {
    %c0_i32 = arith.constant 0 : i32
    %c0_i32_0 = arith.constant 0 : i32
    %c0_i32_1 = arith.constant 0 : i32
    return %c0_i32, %c0_i32_0 : i32, i32
  }
  func.func @transform_13(%arg0: i32) -> (i32, i32) {
    %c0_i32 = arith.constant 0 : i32
    %c0_i32_0 = arith.constant 0 : i32
    %c0_i32_1 = arith.constant 0 : i32
    return %c0_i32, %c0_i32_0 : i32, i32
  }
  func.func @transform_14(%arg0: i32) -> (i32, i32) {
    %c0_i32 = arith.constant 0 : i32
    %c0_i32_0 = arith.constant 0 : i32
    %c0_i32_1 = arith.constant 0 : i32
    return %c0_i32, %c0_i32_0 : i32, i32
  }
  func.func @transform_15(%arg0: i32) -> (i32, i32) {
    %c0_i32 = arith.constant 0 : i32
    %c0_i32_0 = arith.constant 0 : i32
    %c0_i32_1 = arith.constant 0 : i32
    return %c0_i32, %c0_i32_0 : i32, i32
  }
  func.func @transform_16(%arg0: i32) -> (i32, i32) {
    %c0_i32 = arith.constant 0 : i32
    %c0_i32_0 = arith.constant 0 : i32
    %c0_i32_1 = arith.constant 0 : i32
    return %c0_i32, %c0_i32_0 : i32, i32
  }
  func.func @transform_17(%arg0: i32) -> (i32, i32) {
    %c0_i32 = arith.constant 0 : i32
    %c0_i32_0 = arith.constant 0 : i32
    %c0_i32_1 = arith.constant 0 : i32
    return %c0_i32, %c0_i32_0 : i32, i32
  }
  func.func @transform_18(%arg0: i32) -> (i32, i32, i32) {
    %c0_i32 = arith.constant 0 : i32
    %c0_i32_0 = arith.constant 0 : i32
    %c0_i32_1 = arith.constant 0 : i32
    %c0_i32_2 = arith.constant 0 : i32
    return %c0_i32, %c0_i32_0, %c0_i32_1 : i32, i32, i32
  }
  func.func @transform_19(%arg0: i32) -> (i32, i32, i32) {
    %c0_i32 = arith.constant 0 : i32
    %c0_i32_0 = arith.constant 0 : i32
    %c0_i32_1 = arith.constant 0 : i32
    %c0_i32_2 = arith.constant 0 : i32
    return %c0_i32, %c0_i32_0, %c0_i32_1 : i32, i32, i32
  }
  func.func @transform_20(%arg0: i32) -> (i32, i32) {
    %c0_i32 = arith.constant 0 : i32
    %c0_i32_0 = arith.constant 0 : i32
    %c0_i32_1 = arith.constant 0 : i32
    return %c0_i32, %c0_i32_0 : i32, i32
  }
  func.func @transform_21(%arg0: i32) -> (i32, i32) {
    %c0_i32 = arith.constant 0 : i32
    %c0_i32_0 = arith.constant 0 : i32
    %c0_i32_1 = arith.constant 0 : i32
    return %c0_i32, %c0_i32_0 : i32, i32
  }
  func.func @transform_22(%arg0: i32) -> (i32, i32) {
    %c0_i32 = arith.constant 0 : i32
    %c0_i32_0 = arith.constant 0 : i32
    %c0_i32_1 = arith.constant 0 : i32
    return %c0_i32, %c0_i32_0 : i32, i32
  }
  func.func @transform_23(%arg0: i32) -> (i32, i32) {
    %c0_i32 = arith.constant 0 : i32
    %c0_i32_0 = arith.constant 0 : i32
    %c0_i32_1 = arith.constant 0 : i32
    return %c0_i32, %c0_i32_0 : i32, i32
  }
  func.func @transform_24(%arg0: i32) -> (i32, i32) {
    %c0_i32 = arith.constant 0 : i32
    %c0_i32_0 = arith.constant 0 : i32
    return %arg0, %c0_i32 : i32, i32
  }
}

</mosaic_0001>

<bundles_post_ra>
// kernel: _lambda_.1
= control target key start
LH: loop header
LB: loop body
LE: loop exit
PB: predicated region body
PF: predicated region fallthrough
CT: control target
= control target key end

     0   :  { %s3685_s0 = inlined_call_operand.vmem [shape: s32[2,8,1], index: 0, kind: input, shape index: {}]   ;;  %s3686_s1 = inlined_call_operand.vmem [shape: s32[2,8,1], index: 1, kind: input, shape index: {}]   ;;  %s3687_s2 = inlined_call_operand.vmem [shape: f32[2,1,8], index: 2, kind: input, shape index: {}]   ;;  %s3688_s3 = inlined_call_operand.hbm [shape: f32[20,32], index: 3, kind: input, shape index: {}]   ;;  %s3689_s4 = inlined_call_operand.vmem [shape: f32[3,32], index: 4, kind: input, shape index: {}]   ;;  %s3690_s5 = inlined_call_operand.vmem [shape: f32[8,32], index: 5, kind: input, shape index: {}]   ;;  %s3691_s6 = inlined_call_operand.vmem [shape: f32[1,32], index: 6, kind: input, shape index: {}, may-alias: {6,12}]   ;;  %s3692_s7 = inlined_call_operand.vmem [shape: f32[1,32], index: 7, kind: input, shape index: {}, may-alias: {7,11,13,17}]   ;;  %s3693_s8 = inlined_call_operand.hbm [shape: f32[32,96], index: 8, kind: input, shape index: {}]   ;;  %s3694_s9 = inlined_call_operand.vmem [shape: f32[1,96], index: 9, kind: input, shape index: {}]   ;;  %s3695_s10 = inlined_call_operand.hbm [shape: f32[32,32], index: 10, kind: input, shape index: {}]   ;;  %s3696_s11 = inlined_call_operand.vmem [shape: f32[1,32], index: 11, kind: input, shape index: {}, may-alias: {7,11,13,17}]   ;;  %s3697_s12 = inlined_call_operand.vmem [shape: f32[1,32], index: 12, kind: input, shape index: {}, may-alias: {6,12}]   ;;  %s3698_s13 = inlined_call_operand.vmem [shape: f32[1,32], index: 13, kind: input, shape index: {}, may-alias: {7,11,13,17}]   ;;  %s3699_s14 = inlined_call_operand.hbm [shape: f32[32,128], index: 14, kind: input, shape index: {}]   ;;  %s3700_s15 = inlined_call_operand.vmem [shape: f32[1,128], index: 15, kind: input, shape index: {}]   ;;  %s3701_s16 = inlined_call_operand.hbm [shape: f32[128,32], index: 16, kind: input, shape index: {}]   ;;  %s3702_s17 = inlined_call_operand.vmem [shape: f32[1,32], index: 17, kind: input, shape index: {}, may-alias: {7,11,13,17}]   ;;  %s3703_s18 = inlined_call_operand.vmem [shape: f32[1,1,32], index: 18, kind: input, shape index: {}]   ;;  %s3704_s19 = inlined_call_operand.<no memory space> [shape: f32[1,1,1], index: 19, kind: input, shape index: {}]   ;;  %s3705_s20 = inlined_call_operand.vmem [shape: f32[32,32], index: 20, kind: input, shape index: {}]   ;;  %s3706_s21 = inlined_call_operand.vmem [shape: f32[1,32], index: 21, kind: input, shape index: {}]   ;;  %s3707_s22 = inlined_call_operand.vmem [shape: f32[32,2], index: 22, kind: input, shape index: {}]   ;;  %s3708_s23 = inlined_call_operand.vmem [shape: f32[1,2], index: 23, kind: input, shape index: {}]   ;;  %s3709_s24 = inlined_call_operand.hbm [shape: f32[2,2], index: 24, kind: output, shape index: {}]  }
   0x1   :  { %3716 = sst [smem:[#allocation17_spill]] %s3685_s0  ;;  %v29_v0 = vstv %s3704_s19 }
   0x2   :  { %3717 = sst [smem:[#allocation18_spill]] %s3686_s1  ;;  %30 = vst [vmem:[#allocation2] sm:$0x1] %v29_v0 }
   0x3   :  { %3718 = sst [smem:[#allocation19_spill]] %s3687_s2 }
   0x4   :  { %3719 = sst [smem:[#allocation20_spill]] %s3688_s3 }
   0x5   :  { %3720 = sst [smem:[#allocation21_spill]] %s3689_s4 }
   0x6   :  { %3721 = sst [smem:[#allocation22_spill]] %s3690_s5 }
   0x7   :  { %3722 = sst [smem:[#allocation23_spill]] %s3691_s6 }
   0x8   :  { %3723 = sst [smem:[#allocation24_spill]] %s3692_s7 }
   0x9   :  { %3724 = sst [smem:[#allocation25_spill]] %s3693_s8 }
   0xa   :  { %3725 = sst [smem:[#allocation26_spill]] %s3709_s24 }
   0xb   :  { %31 = vsyncpa [#allocation4], 0 }
   0xc   :  { %32 = vsyncpa [#allocation7], 0 }
   0xd   :  { %33 = vsyncpa [#allocation10], 0 }
   0xe   :  { %34 = vsyncpa [#allocation5], 0  ;;  %s3136_s27 = smov [#allocation6]   ;;  %s3137_s6 = smov [#allocation9]  }
   0xf   :  { %s66_s28 = sshll.u32 %s3136_s27, 4  ;;  %s98_s2 = sshll.u32 %s3137_s6, 4  ;;  %s67_s28 = int_to_ptr.vmem [resolvable:$true] %s66_s28  ;;  %s3290_s2 = int_to_ptr.vmem [resolvable:$true] %s98_s2 }
  0x10   :  { %s3726_s7 = sld [smem:[#allocation25_spill]] }
  0x16   :  { %s2996_s30 = scalar_lea.hbm %s3726_s7, 512 }
  0x17   :  { %p2997_p0 = scmp.ne.s32.totalorder %s3726_s7, %s2996_s30  ;;  %p3000_p1 = scmp.lt.u32.totalorder %s2996_s30, %s3726_s7 }
  0x19   :  { %p3002_p2 = pnand %p3000_p1, %p2997_p0 }
  0x1b   :  { %3005 = shalt.err (!%p3002_p2)
}
  0x1c   :  { %s3006_s4 = scalar_lea.vmem %s67_s28, 512  ;;  %p3011_p4 = scmp.lt.s32.totalorder %s67_s28, %s67_s28 }
  0x1d   :  { %p3007_p3 = scmp.ne.s32.totalorder %s67_s28, %s3006_s4  ;;  %p3012_p5 = scmp.lt.s32.totalorder %s3006_s4, %s3006_s4 }
  0x1f   :  { %p3013_p6 = por %p3012_p5, %p3011_p4 }
  0x21   :  { %p3014_p7 = pnand %p3013_p6, %p3007_p3 }
  0x23   :  { %3017 = shalt.err (!%p3014_p7)
}
  0x24   :  { %s3138_s1 = smov 128   ;;  %s3139_s5 = smov 8  }
  0x25   :  { %72 = dma.hbm_to_vmem [thread:$0]  %s3726_s7, 512, %s67_s28, [#allocation7], %s3138_s1, %s3138_s1, %s3139_s5  }
  0x26   :  { %s3018_s0 = scalar_lea.hbm %s3699_s14, 512 }
  0x27   :  { %p3019_p8 = scmp.ne.s32.totalorder %s3699_s14, %s3018_s0  ;;  %p3022_p9 = scmp.lt.u32.totalorder %s3018_s0, %s3699_s14 }
  0x29   :  { %p3024_p10 = pnand %p3022_p9, %p3019_p8 }
  0x2b   :  { %3027 = shalt.err (!%p3024_p10)
}
  0x2c   :  { %s3028_s8 = scalar_lea.vmem %s3290_s2, 512  ;;  %p3033_p12 = scmp.lt.s32.totalorder %s3290_s2, %s3290_s2 }
  0x2d   :  { %p3029_p11 = scmp.ne.s32.totalorder %s3290_s2, %s3028_s8  ;;  %p3034_p13 = scmp.lt.s32.totalorder %s3028_s8, %s3028_s8 }
  0x2f   :  { %p3035_p0 = por %p3034_p13, %p3033_p12 }
  0x31   :  { %p3036_p1 = pnand %p3035_p0, %p3029_p11 }
  0x33   :  { %3039 = shalt.err (!%p3036_p1)
}
  0x34   :  { %104 = dma.hbm_to_vmem [thread:$0]  %s3699_s14, 512, %s3290_s2, [#allocation10], %s3138_s1, %s3138_s1, %s3139_s5  }
  0x35   :  { %s3140_s4 = smov [#allocation3]   ;;  %s3141_s27 = smov [#allocation8]  }
  0x36   :  { %s46_s26 = sshll.u32 %s3140_s4, 4  ;;  %s80_s6 = sshll.u32 %s3141_s27, 4  ;;  %s47_s26 = int_to_ptr.vmem [resolvable:$true] %s46_s26  ;;  %s3327_s6 = int_to_ptr.vmem [resolvable:$true] %s80_s6 }
  0x37   :  { %s3727_s30 = sld [smem:[#allocation20_spill]] }
  0x3d   :  { %s3040_s3 = scalar_lea.hbm %s3727_s30, 384 }
  0x3e   :  { %p3041_p2 = scmp.ne.s32.totalorder %s3727_s30, %s3040_s3  ;;  %p3044_p3 = scmp.lt.u32.totalorder %s3040_s3, %s3727_s30 }
  0x40   :  { %p3046_p4 = pnand %p3044_p3, %p3041_p2 }
  0x42   :  { %3049 = shalt.err (!%p3046_p4)
}
  0x43   :  { %s3050_s14 = scalar_lea.vmem %s47_s26, 384  ;;  %p3055_p6 = scmp.lt.s32.totalorder %s47_s26, %s47_s26 }
  0x44   :  { %p3051_p5 = scmp.ne.s32.totalorder %s47_s26, %s3050_s14  ;;  %p3056_p7 = scmp.lt.s32.totalorder %s3050_s14, %s3050_s14 }
  0x46   :  { %p3057_p8 = por %p3056_p7, %p3055_p6 }
  0x48   :  { %p3058_p9 = pnand %p3057_p8, %p3051_p5 }
  0x4a   :  { %3061 = shalt.err (!%p3058_p9)
}
  0x4b   :  { %52 = dma.hbm_to_vmem [thread:$0]  %s3727_s30, 384, %s47_s26, [#allocation4], %s3138_s1, %s3138_s1, %s3139_s5  }
  0x4c   :  { %s3062_s24 = scalar_lea.hbm %s3695_s10, 512 }
  0x4d   :  { %p3063_p10 = scmp.ne.s32.totalorder %s3695_s10, %s3062_s24  ;;  %p3066_p11 = scmp.lt.u32.totalorder %s3062_s24, %s3695_s10 }
  0x4f   :  { %p3068_p12 = pnand %p3066_p11, %p3063_p10 }
  0x51   :  { %3071 = shalt.err (!%p3068_p12)
}
  0x52   :  { %s3072_s25 = scalar_lea.vmem %s3327_s6, 512  ;;  %p3077_p0 = scmp.lt.s32.totalorder %s3327_s6, %s3327_s6 }
  0x53   :  { %p3073_p13 = scmp.ne.s32.totalorder %s3327_s6, %s3072_s25  ;;  %p3078_p1 = scmp.lt.s32.totalorder %s3072_s25, %s3072_s25 }
  0x55   :  { %p3079_p2 = por %p3078_p1, %p3077_p0 }
  0x57   :  { %p3080_p3 = pnand %p3079_p2, %p3073_p13 }
  0x59   :  { %3083 = shalt.err (!%p3080_p3)
}
  0x5a   :  { %86 = dma.hbm_to_vmem [thread:$0]  %s3695_s10, 512, %s3327_s6, [#allocation7], %s3138_s1, %s3138_s1, %s3139_s5  }
  0x5b   :  { %s3142_s19 = smov [#allocation11]   ;;  %s3084_s28 = scalar_lea.hbm %s3701_s16, 2048 }
  0x5c   :  { %s112_s8 = sshll.u32 %s3142_s19, 4  ;;  %p3085_p4 = scmp.ne.s32.totalorder %s3701_s16, %s3084_s28  ;;  %s113_s8 = int_to_ptr.vmem [resolvable:$true] %s112_s8 }
  0x5d   :  { %p3088_p5 = scmp.lt.u32.totalorder %s3084_s28, %s3701_s16 }
  0x5f   :  { %p3090_p6 = pnand %p3088_p5, %p3085_p4 }
  0x61   :  { %3093 = shalt.err (!%p3090_p6)
}
  0x62   :  { %s3094_s29 = scalar_lea.vmem %s113_s8, 2048  ;;  %p3099_p8 = scmp.lt.s32.totalorder %s113_s8, %s113_s8 }
  0x63   :  { %p3095_p7 = scmp.ne.s32.totalorder %s113_s8, %s3094_s29  ;;  %p3100_p9 = scmp.lt.s32.totalorder %s3094_s29, %s3094_s29 }
  0x65   :  { %p3101_p10 = por %p3100_p9, %p3099_p8 }
  0x67   :  { %p3102_p11 = pnand %p3101_p10, %p3095_p7 }
  0x69   :  { %3105 = shalt.err (!%p3102_p11)
}
  0x6a   :  { %118 = dma.hbm_to_vmem [thread:$0]  %s3701_s16, 2048, %s113_s8, [#allocation10], %s3138_s1, %s3138_s1, %s3139_s5  }
  0x6b   :  { %3128 = dma.done.wait [#allocation4], 384  }
  0x6c   :  { %3129 = vsyncadd [#allocation4], 4294966912 }
  0x6d   :  { %3130 = dma.done.wait [#allocation7], 1024  }
  0x6e   :  { %3131 = vsyncadd [#allocation7], 4294966272 }
  0x6f   :  { %3132 = dma.done.wait [#allocation10], 2560  }
  0x70   :  { %3133 = vsyncadd [#allocation10], 4294964736  ;;  %v3143_v1 = vmov 0   ;;  %s3728_s25 = sld [smem:[#allocation18_spill]]  ;;  %s3729_s19 = sld [smem:[#allocation17_spill]]  ;;  %vm189_vm0 = vcmask 1042432   ;;  %v152_v10 = vlaneseq }
  0x71   :  { %2936 = vset.pattern.permute.xlu0 %v3143_v1  ;;  %2937 = vset.pattern.permute.xlu1 %v3143_v1  ;;  %s3730_s7 = sld [smem:[#allocation21_spill]]  ;;  %v178_v7 = vld [vmem:[#allocation3] sm:$0xff]  ;;  %v179_v8 = vld [vmem:[#allocation3 + $0x8] sm:$0xff]  ;;  %vm182_vm1 = vcmask 23552   ;;  %v3144_v14 = vmov 0.0   ;;  %vm268_vm5 = vcmask 162816  }
  0x72   :  { %v2836_v9 = vpack.c.bf16 %v179_v8, %v178_v7  ;;  %v153_v11 = vand.u32 127, %v152_v10  ;;  %v180_v19 = vld [vmem:[#allocation3 + $0x10] sm:$0xf]  ;;  %vm275_vm6 = vcmask 1043456   ;;  %s3731_s27 = sld [smem:[#allocation22_spill]]  ;;  %vm377_vm8 = vcmask 261120  }
  0x73   :  { %v421_v39 = vld [vmem:[#allocation6] sm:$0xff]  ;;  %v422_v40 = vld [vmem:[#allocation6 + $0x8] sm:$0xff]  ;;  %v423_v41 = vld [vmem:[#allocation6 + $0x10] sm:$0xff]  ;;  %s3732_s6 = sld [smem:[#allocation23_spill]]  ;;  %vm3145_vm9 = vmmov 0   ;;  %s3146_s16 = smov 96  }
  0x74   :  { %v2840_v42 = vpack.c.bf16 %v422_v40, %v421_v39  ;;  %v424_v43 = vld [vmem:[#allocation6 + $0x18] sm:$0xff]  ;;  %v2524_v61 = vld [vmem:[%s3694_s9] ss:$0 sm:$0xff]  ;;  %vm516_vm10 = vcmask 64512   ;;  %s3734_s8 = sld [smem:[#allocation19_spill]]  ;;  %s3147_s28 = smov 64  }
  0x75   :  { %v2844_v44 = vpack.c.bf16 %v424_v43, %v423_v41  ;;  %s3149_s4 = smov 120   ;;  %s3150_s24 = smov 56   ;;  %vm1858_vm11 = vcmask 130048   ;;  %vm1861_vm12 = vcmask 195584   ;;  %vm2242_vm15 = vcmask 7168  }
  0x76   :  { %v150_v2 = vld [vmem:[%s3728_s25] sm:$0xff]  ;;  %v151_v4 = vld [vmem:[%s3728_s25 + $0x8] sm:$0xff]  ;;  %2841 = vmatprep.subr.bf16.mxu1 %v2840_v42  ;;  %s3733_s25 = sld [smem:[#allocation24_spill]]  ;;  %s3152_s29 = smov 112  }
  0x77   :  { %v148_v3 = vld [vmem:[%s3729_s19] sm:$0xff]  ;;  %167 = vperm.xlu0 %2936, %v150_v2   ;;  %v149_v5 = vld [vmem:[%s3729_s19 + $0x8] sm:$0xff]  ;;  %2843 = vmatpush3.bf16.msra.mxu1 %v2840_v42  ;;  %s3153_s10 = smov 48   ;;  %s3155_s0 = smov 104  }
  0x78   :  { %155 = vperm.xlu1 %2937, %v148_v3   ;;  %v181_v6 = vld [vmem:[%s3730_s7] sm:$0x7]  ;;  %2845 = vmatprep.subr.bf16.mxu1 %v2844_v44  ;;  %s3148_s7 = smov 88   ;;  %s3156_s3 = smov 40  }
  0x79   :  { %2652 = vmatprep.subr.msk.mxu0 %vm189_vm0, %v181_v6  ;;  %v354_v22 = vld [vmem:[%s3731_s27] sm:$0xff]  ;;  %s3151_s27 = smov 80  }
  0x7a   :  { %2653 = vmatpush3.msk.msra.mxu0 %vm189_vm0, %v181_v6  ;;  %v2522_v52 = vld [vmem:[%s3732_s6] ss:$0 sm:$0xff]  ;;  %s3154_s6 = smov 72   ;;  %vm2320_vm0 = vcmask 1041409  }
  0x7b   :  { %170 = vperm.xlu0 %2936, %v151_v4   ;;  %2837 = vmatprep.subr.bf16.mxu0 %v2836_v9  ;;  %v3451_v4 = vld [vmem:[%s3734_s8 + $0x1] ss:$0 sm:$0xff] }
  0x7c   :  { %158 = vperm.xlu1 %2937, %v149_v5   ;;  %2847 = vmatpush3.bf16.msra.mxu1 %v2844_v44  ;;  %v2523_v54 = vld [vmem:[%s3733_s25] ss:$0 sm:$0xff]  ;;  %s3157_s25 = smov 16  }
  0x7d   :  { %2682 = vmatprep.subr.mxu1 %v3144_v14  ;;  %v3456_v5 = vld [vmem:[%s3734_s8] ss:$0 sm:$0xff] }
  0xf6   :  { %v168_v12 = vpop.permute.xlu0 %167 }
  0xf7   :  { %vm172_vm2 = vcmp.eq.s32.totalorder %v168_v12, %v153_v11  ;;  %v156_v13 = vpop.permute.xlu1 %155 }
  0xf8   :  { %v2512_v15 = vsel %vm172_vm2, 1.0, %v3144_v14  ;;  %vm160_vm3 = vcmp.eq.s32.totalorder %v156_v13, %v153_v11 }
  0xf9   :  { %2654 = vmatprep.mubr.msk.f32.mxu0 %vm182_vm1, %v2512_v15  ;;  %v2510_v17 = vsel %vm160_vm3, 1.0, %v3144_v14 }
  0xfa   :  { %v171_v16 = vpop.permute.xlu0 %170 }
  0xfb   :  { %vm173_vm4 = vcmp.eq.s32.totalorder %v171_v16, %v153_v11  ;;  %v159_v20 = vpop.permute.xlu1 %158 }
  0xfc   :  { %v2513_v18 = vsel %vm173_vm4, 1.0, %v3144_v14  ;;  %vm161_vm7 = vcmp.eq.s32.totalorder %v159_v20, %v153_v11 }
  0xfd   :  { %2655 = vmatmul.mubr.msk.f32.vlgmr.msra.gmra.mrb[0].mxu0 %vm182_vm1, %v2513_v18  ;;  %v2511_v21 = vsel %vm161_vm7, 1.0, %v3144_v14  ;;  %vm2479_vm1 = vcmask 9216  }
  0xfe   :  { %2839 = vmatpush3.bf16.msra.mxu0 %v2836_v9  ;;  %2663 = vmatprep.mubr.msk.f32.mxu0 %vm268_vm5, %v2510_v17 }
  0xff   :  { %2661 = vmatprep.subr.msk.mxu0 %vm275_vm6, %v180_v19 }
 0x102   :  { %2662 = vmatpush3.msk.msra.mxu0 %vm275_vm6, %v180_v19 }
 0x103   :  { %2677 = vmatprep.subr.mxu0 %v3144_v14 }
 0x105   :  { %2664 = vmatmul.mubr.msk.f32.vlgmr.msra.gmra.mrb[0].mxu0 %vm268_vm5, %v2511_v21 }
 0x106   :  { %2679 = vmatprep.mubr.msk.f32.mxu0 %vm3145_vm9, %v3144_v14 }
 0x1d8   :  { %v2665_v23 = vpop.f32.mrb[0].mxu0 }
 0x1d9   :  { %v3402_v24 = vadd.f32 %v2665_v23, %v354_v22  ;;  %v345_v25 = vpop.f32.mrb[1].mxu0 }
 0x1da   :  { %v3404_v26 = vadd.f32 %v354_v22, %v345_v25 }
 0x1db   :  { %v381_v27 = vsel %vm377_vm8, %v3402_v24, 0.0 }
 0x1dc   :  { %382 = vadd.xlane.f32.xlu1 %v381_v27  ;;  %v378_v28 = vsel %vm377_vm8, %v3404_v26, 0.0 }
 0x1dd   :  { %379 = vadd.xlane.f32.xlu0 %v378_v28 }
 0x269   :  { %v383_v29 = vpop.xlane.xlu1 %382 }
 0x26a   :  { %v386_v30 = vmul.f32 0.03125, %v383_v29  ;;  %v380_v31 = vpop.xlane.xlu0 %379 }
 0x26b   :  { %v385_v32 = vmul.f32 0.03125, %v380_v31 }
 0x26c   :  { %v388_v33 = vsub.f32 %v3402_v24, %v386_v30 }
 0x26d   :  { %v387_v34 = vsub.f32 %v3404_v26, %v385_v32 }
 0x26e   :  { %v390_v37 = vmul.f32 %v388_v33, %v388_v33 }
 0x26f   :  { %v389_v35 = vmul.f32 %v387_v34, %v387_v34 }
 0x270   :  { %v394_v38 = vsel %vm377_vm8, %v390_v37, 0.0 }
 0x271   :  { %v391_v36 = vsel %vm377_vm8, %v389_v35, 0.0 }
 0x272   :  { %392 = vadd.xlane.f32.xlu0 %v391_v36 }
 0x276   :  { %395 = vadd.xlane.f32.xlu0 %v394_v38 }
 0x2ff   :  { %v393_v45 = vpop.xlane.xlu0 %392 }
 0x300   :  { %v397_v46 = vmul.f32 0.03125, %v393_v45 }
 0x302   :  { %v399_v47 = vadd.f32 1e-06, %v397_v46 }
 0x303   :  { %v396_v48 = vpop.xlane.xlu0 %395 }
 0x304   :  { %2938 = vrsqrt.f32 %v399_v47  ;;  %v398_v49 = vmul.f32 0.03125, %v396_v48 }
 0x306   :  { %v400_v50 = vadd.f32 1e-06, %v398_v49 }
 0x308   :  { %2940 = vrsqrt.f32 %v400_v50 }
 0x30e   :  { %v2939_v51 = vpop.eup %2938 }
 0x30f   :  { %v403_v53 = vmul.f32 %v2939_v51, %v387_v34 }
 0x311   :  { %v411_v55 = vmul.f32 %v2522_v52, %v403_v53 }
 0x312   :  { %v2941_v56 = vpop.eup %2940 }
 0x313   :  { %v404_v57 = vmul.f32 %v2941_v56, %v388_v33  ;;  %v419_v58 = vadd.f32 %v2523_v54, %v411_v55 }
 0x315   :  { %v412_v59 = vmul.f32 %v2522_v52, %v404_v57  ;;  %2674 = vmatprep.mubr.msk.f32.mxu1 %vm377_vm8, %v419_v58 }
 0x317   :  { %v420_v60 = vadd.f32 %v2523_v54, %v412_v59 }
 0x319   :  { %2675 = vmatmul.mubr.msk.f32.vlgmr.msra.gmra.mrb[0].mxu1 %vm377_vm8, %v420_v60 }
 0x31a   :  { %2684 = vmatprep.mubr.msk.f32.mxu1 %vm3145_vm9, %v3144_v14 }
 0x3ec   :  { %v2676_v62 = vpop.f32.mrb[0].mxu1 }
 0x3ed   :  { %v3430_v63 = vadd.f32 %v2676_v62, %v2524_v61  ;;  %v504_v0 = vpop.f32.mrb[1].mxu1 }
 0x3ee   :  { %v3432_v1 = vadd.f32 %v2524_v61, %v504_v0 }
 0x3ef   :  { %592 = vrot.lane.b32.xlu0 %v3430_v63, %s3146_s16 }
 0x3f0   :  { %514 = vrot.lane.b32.xlu1 %v3432_v1, %s3146_s16 }
 0x461   :  { %v593_v2 = vpop.permute.xlu0 %592 }
 0x462   :  { %2683 = vmatpush3.xpose.msk.msra.mxu1 %vm516_vm10, %v593_v2  ;;  %v515_v3 = vpop.permute.xlu1 %514 }
 0x463   :  { %2678 = vmatpush3.xpose.msk.msra.mxu0 %vm516_vm10, %v515_v3  ;;  %2692 = vmatprep.subr.mxu1 %v3144_v14 }
 0x464   :  { %2687 = vmatprep.subr.mxu0 %v3144_v14 }
 0x465   :  { %2685 = vmatmul.mubr.msk.f32.vlgmr.msra.gmra.mrb[2].mxu1 %vm516_vm10, %v3430_v63 }
 0x466   :  { %2680 = vmatmul.mubr.msk.f32.vlgmr.msra.gmra.mrb[2].mxu0 %vm516_vm10, %v3432_v1  ;;  %2694 = vmatprep.mubr.msk.f32.mxu1 %vm3145_vm9, %v3144_v14 }
 0x467   :  { %2689 = vmatprep.mubr.msk.f32.mxu0 %vm3145_vm9, %v3144_v14 }
 0x538   :  { %v664_v6 = vpop.f32.mrb[2].mxu1 }
 0x539   :  { %v665_v7 = vadd.f32 %v3451_v4, %v664_v6  ;;  %v587_v8 = vpop.f32.mrb[2].mxu0  ;;  %v2686_v9 = vpop.f32.mrb[3].mxu1 }
 0x53a   :  { %v588_v10 = vadd.f32 %v3456_v5, %v587_v8  ;;  %v2681_v11 = vpop.f32.mrb[3].mxu0 }
 0x53b   :  { %v671_v12 = vsel %vm516_vm10, %v665_v7, -inf }
 0x53c   :  { %672 = vmax.xlane.f32.xlu0 %v671_v12  ;;  %v668_v13 = vsel %vm516_vm10, %v588_v10, -inf }
 0x53d   :  { %669 = vmax.xlane.f32.xlu1 %v668_v13 }
 0x54e   :  { %690 = vrot.lane.b32.xlu1 %v3432_v1, %s3147_s28 }
 0x552   :  { %766 = vrot.lane.b32.xlu0 %v3430_v63, %s3147_s28  ;;  %844 = vrot.lane.b32.xlu1 %v3432_v1, %s3148_s7 }
 0x556   :  { %922 = vrot.lane.b32.xlu1 %v3430_v63, %s3148_s7 }
 0x5c9   :  { %v673_v15 = vpop.xlane.xlu0 %672 }
 0x5ca   :  { %v675_v16 = vsub.f32 %v665_v7, %v673_v15  ;;  %v670_v17 = vpop.xlane.xlu1 %669 }
 0x5cb   :  { %v674_v18 = vsub.f32 %v588_v10, %v670_v17 }
 0x5cc   :  { %v678_v19 = vmul.f32 1.442695, %v675_v16 }
 0x5cd   :  { %v676_v20 = vmul.f32 1.442695, %v674_v18  ;;  %v767_v21 = vpop.permute.xlu0 %766 }
 0x5ce   :  { %2942 = vpow2.f32 %v678_v19  ;;  %2693 = vmatpush3.msra.mxu1 %v767_v21  ;;  %v691_v22 = vpop.permute.xlu1 %690 }
 0x5cf   :  { %2944 = vpow2.f32 %v676_v20  ;;  %2688 = vmatpush3.msra.mxu0 %v691_v22  ;;  %2702 = vmatprep.subr.mxu1 %v3144_v14 }
 0x5d0   :  { %2697 = vmatprep.subr.mxu0 %v3144_v14 }
 0x5d2   :  { %v845_v29 = vpop.permute.xlu1 %844 }
 0x5d6   :  { %v923_v30 = vpop.permute.xlu1 %922 }
 0x5d8   :  { %v2943_v23 = vpop.eup %2942 }
 0x5d9   :  { %v2945_v25 = vpop.eup %2944  ;;  %v683_v27 = vsel %vm516_vm10, %v2943_v23, 0.0 }
 0x5da   :  { %684 = vadd.xlane.f32.xlu0 %v683_v27  ;;  %v680_v28 = vsel %vm516_vm10, %v2945_v25, 0.0 }
 0x5db   :  { %681 = vadd.xlane.f32.xlu1 %v680_v28 }
 0x5ec   :  { %920 = vrot.lane.b32.xlu1 %v3430_v63, %s3149_s4 }
 0x5f0   :  { %842 = vrot.lane.b32.xlu0 %v3432_v1, %s3149_s4 }
 0x667   :  { %v685_v31 = vpop.xlane.xlu0 %684 }
 0x668   :  { %2946 = vrcp.f32 %v685_v31  ;;  %v682_v32 = vpop.xlane.xlu1 %681 }
 0x669   :  { %2948 = vrcp.f32 %v682_v32 }
 0x66b   :  { %v843_v38 = vpop.permute.xlu0 %842 }
 0x66c   :  { %v921_v37 = vpop.permute.xlu1 %920 }
 0x672   :  { %v2947_v33 = vpop.eup %2946 }
 0x673   :  { %v2949_v34 = vpop.eup %2948  ;;  %v689_v35 = vmul.f32 %v2947_v33, %v2943_v23 }
 0x674   :  { %v688_v36 = vmul.f32 %v2949_v34, %v2945_v25 }
 0x675   :  { %2695 = vmatmul.mubr.msk.f32.vlgmr.msra.gmra.mrb[4].mxu1 %vm516_vm10, %v689_v35 }
 0x676   :  { %2703 = vmatpush3.xpose.msk.msra.mxu1 %vm516_vm10, %v923_v30  ;;  %2690 = vmatmul.mubr.msk.f32.vlgmr.msra.gmra.mrb[4].mxu0 %vm516_vm10, %v688_v36 }
 0x677   :  { %2698 = vmatpush3.xpose.msk.msra.mxu0 %vm516_vm10, %v845_v29  ;;  %2704 = vmatprep.mubr.msk.f32.mxu1 %vm3145_vm9, %v3144_v14 }
 0x678   :  { %2699 = vmatprep.mubr.msk.f32.mxu0 %vm3145_vm9, %v3144_v14  ;;  %2707 = vmatprep.subr.mxu0 %v3144_v14 }
 0x679   :  { %2705 = vmatmul.mubr.msk.f32.vlgmr.msra.gmra.mrb[6].mxu1 %vm516_vm10, %v921_v37  ;;  %2712 = vmatprep.subr.mxu1 %v3144_v14 }
 0x67a   :  { %2700 = vmatmul.mubr.msk.f32.vlgmr.msra.gmra.mrb[6].mxu0 %vm516_vm10, %v843_v38  ;;  %2714 = vmatprep.mubr.msk.f32.mxu1 %vm3145_vm9, %v3144_v14 }
 0x67b   :  { %2709 = vmatprep.mubr.msk.f32.mxu0 %vm3145_vm9, %v3144_v14 }
 0x748   :  { %v3488_v39 = vpop.f32.mrb[4].mxu1 }
 0x749   :  { %v3490_v40 = vpop.f32.mrb[4].mxu0  ;;  %v2696_v41 = vpop.f32.mrb[5].mxu1 }
 0x74a   :  { %v2691_v42 = vpop.f32.mrb[5].mxu0 }
 0x74c   :  { %v994_v43 = vpop.f32.mrb[6].mxu1 }
 0x74d   :  { %v995_v44 = vadd.f32 %v3451_v4, %v994_v43  ;;  %v916_v45 = vpop.f32.mrb[6].mxu0  ;;  %v2706_v46 = vpop.f32.mrb[7].mxu1 }
 0x74e   :  { %v917_v47 = vadd.f32 %v3456_v5, %v916_v45  ;;  %v2701_v48 = vpop.f32.mrb[7].mxu0 }
 0x74f   :  { %v1001_v49 = vsel %vm516_vm10, %v995_v44, -inf }
 0x750   :  { %1002 = vmax.xlane.f32.xlu1 %v1001_v49  ;;  %v998_v50 = vsel %vm516_vm10, %v917_v47, -inf }
 0x751   :  { %999 = vmax.xlane.f32.xlu0 %v998_v50 }
 0x761   :  { %1020 = vrot.lane.b32.xlu1 %v3432_v1, %s3150_s24 }
 0x765   :  { %1174 = vrot.lane.b32.xlu1 %v3432_v1, %s3151_s27 }
 0x767   :  { %1096 = vrot.lane.b32.xlu0 %v3430_v63, %s3150_s24 }
 0x769   :  { %1252 = vrot.lane.b32.xlu1 %v3430_v63, %s3151_s27 }
 0x76d   :  { %1250 = vrot.lane.b32.xlu1 %v3430_v63, %s3152_s29 }
 0x7dd   :  { %v1003_v51 = vpop.xlane.xlu1 %1002 }
 0x7de   :  { %v1005_v52 = vsub.f32 %v995_v44, %v1003_v51  ;;  %v1000_v53 = vpop.xlane.xlu0 %999 }
 0x7df   :  { %v1004_v54 = vsub.f32 %v917_v47, %v1000_v53 }
 0x7e0   :  { %v1008_v55 = vmul.f32 1.442695, %v1005_v52 }
 0x7e1   :  { %v1006_v56 = vmul.f32 1.442695, %v1004_v54  ;;  %v1021_v57 = vpop.permute.xlu1 %1020 }
 0x7e2   :  { %2950 = vpow2.f32 %v1008_v55  ;;  %2708 = vmatpush3.msra.mxu0 %v1021_v57  ;;  %v1097_v58 = vpop.permute.xlu0 %1096 }
 0x7e3   :  { %2713 = vmatpush3.msra.mxu1 %v1097_v58  ;;  %2717 = vmatprep.subr.mxu0 %v3144_v14  ;;  %2952 = vpow2.f32 %v1006_v56 }
 0x7e4   :  { %2722 = vmatprep.subr.mxu1 %v3144_v14 }
 0x7e5   :  { %v1175_v3 = vpop.permute.xlu1 %1174 }
 0x7e9   :  { %v1253_v7 = vpop.permute.xlu1 %1252 }
 0x7ec   :  { %v2951_v59 = vpop.eup %2950 }
 0x7ed   :  { %v1013_v60 = vsel %vm516_vm10, %v2951_v59, 0.0  ;;  %v2953_v61 = vpop.eup %2952  ;;  %v1251_v11 = vpop.permute.xlu1 %1250 }
 0x7ee   :  { %1014 = vadd.xlane.f32.xlu0 %v1013_v60  ;;  %v1010_v62 = vsel %vm516_vm10, %v2953_v61, 0.0 }
 0x7f2   :  { %1011 = vadd.xlane.f32.xlu0 %v1010_v62 }
 0x808   :  { %1172 = vrot.lane.b32.xlu0 %v3432_v1, %s3152_s29 }
 0x87b   :  { %v1015_v0 = vpop.xlane.xlu0 %1014 }
 0x87c   :  { %2954 = vrcp.f32 %v1015_v0 }
 0x87f   :  { %v1012_v2 = vpop.xlane.xlu0 %1011 }
 0x880   :  { %2956 = vrcp.f32 %v1012_v2 }
 0x883   :  { %v1173_v12 = vpop.permute.xlu0 %1172 }
 0x886   :  { %v2955_v6 = vpop.eup %2954 }
 0x887   :  { %v1019_v8 = vmul.f32 %v2955_v6, %v2951_v59 }
 0x889   :  { %2715 = vmatmul.mubr.msk.f32.vlgmr.msra.gmra.mrb[8].mxu1 %vm516_vm10, %v1019_v8 }
 0x88a   :  { %v2957_v9 = vpop.eup %2956  ;;  %2723 = vmatpush3.xpose.msk.msra.mxu1 %vm516_vm10, %v1253_v7  ;;  %2724 = vmatprep.mubr.msk.f32.mxu1 %vm3145_vm9, %v3144_v14 }
 0x88b   :  { %v1018_v10 = vmul.f32 %v2957_v9, %v2953_v61  ;;  %2732 = vmatprep.subr.mxu1 %v3144_v14 }
 0x88d   :  { %2710 = vmatmul.mubr.msk.f32.vlgmr.msra.gmra.mrb[8].mxu0 %vm516_vm10, %v1018_v10  ;;  %2725 = vmatmul.mubr.msk.f32.vlgmr.msra.gmra.mrb[10].mxu1 %vm516_vm10, %v1251_v11 }
 0x88e   :  { %2718 = vmatpush3.xpose.msk.msra.mxu0 %vm516_vm10, %v1175_v3  ;;  %2719 = vmatprep.mubr.msk.f32.mxu0 %vm3145_vm9, %v3144_v14 }
 0x88f   :  { %2727 = vmatprep.subr.mxu0 %v3144_v14  ;;  %2734 = vmatprep.mubr.msk.f32.mxu1 %vm3145_vm9, %v3144_v14 }
 0x891   :  { %2720 = vmatmul.mubr.msk.f32.vlgmr.msra.gmra.mrb[10].mxu0 %vm516_vm10, %v1173_v12 }
 0x892   :  { %2729 = vmatprep.mubr.msk.f32.mxu0 %vm3145_vm9, %v3144_v14 }
 0x95c   :  { %v3522_v13 = vpop.f32.mrb[8].mxu1 }
 0x95d   :  { %v2716_v15 = vpop.f32.mrb[9].mxu1 }
 0x960   :  { %v3524_v16 = vpop.f32.mrb[8].mxu0  ;;  %v1324_v17 = vpop.f32.mrb[10].mxu1 }
 0x961   :  { %v1325_v18 = vadd.f32 %v3451_v4, %v1324_v17  ;;  %v2711_v19 = vpop.f32.mrb[9].mxu0  ;;  %v2726_v20 = vpop.f32.mrb[11].mxu1 }
 0x962   :  { %v1864_v20 = vld [vmem:[#allocation8] sm:$0xff] }
 0x963   :  { %v1331_v21 = vsel %vm516_vm10, %v1325_v18, -inf }
 0x964   :  { %1332 = vmax.xlane.f32.xlu1 %v1331_v21  ;;  %v1246_v22 = vpop.f32.mrb[10].mxu0  ;;  %v1865_v21 = vld [vmem:[#allocation8 + $0x8] sm:$0xff] }
 0x965   :  { %v1247_v23 = vadd.f32 %v3456_v5, %v1246_v22  ;;  %v2721_v25 = vpop.f32.mrb[11].mxu0  ;;  %v2848_v22 = vpack.c.bf16 %v1865_v21, %v1864_v20 }
 0x967   :  { %v1328_v27 = vsel %vm516_vm10, %v1247_v23, -inf }
 0x968   :  { %1329 = vmax.xlane.f32.xlu0 %v1328_v27 }
 0x975   :  { %1350 = vrot.lane.b32.xlu1 %v3432_v1, %s3153_s10 }
 0x979   :  { %1504 = vrot.lane.b32.xlu1 %v3432_v1, %s3154_s6 }
 0x97d   :  { %1582 = vrot.lane.b32.xlu1 %v3430_v63, %s3154_s6 }
 0x97e   :  { %1426 = vrot.lane.b32.xlu0 %v3430_v63, %s3153_s10 }
 0x981   :  { %1580 = vrot.lane.b32.xlu1 %v3430_v63, %s3155_s0 }
 0x9f1   :  { %v1333_v28 = vpop.xlane.xlu1 %1332 }
 0x9f2   :  { %v1335_v29 = vsub.f32 %v1325_v18, %v1333_v28 }
 0x9f4   :  { %v1338_v30 = vmul.f32 1.442695, %v1335_v29 }
 0x9f5   :  { %v1351_v31 = vpop.permute.xlu1 %1350  ;;  %v1330_v32 = vpop.xlane.xlu0 %1329 }
 0x9f6   :  { %2958 = vpow2.f32 %v1338_v30  ;;  %v1334_v33 = vsub.f32 %v1247_v23, %v1330_v32  ;;  %2728 = vmatpush3.msra.mxu0 %v1351_v31  ;;  %v1867_v23 = vld [vmem:[#allocation8 + $0x18] sm:$0xff] }
 0x9f7   :  { %2737 = vmatprep.subr.mxu0 %v3144_v14 }
 0x9f8   :  { %v1336_v34 = vmul.f32 1.442695, %v1334_v33 }
 0x9f9   :  { %v1427_v35 = vpop.permute.xlu0 %1426  ;;  %v1505_v44 = vpop.permute.xlu1 %1504 }
 0x9fa   :  { %2960 = vpow2.f32 %v1336_v34  ;;  %2733 = vmatpush3.msra.mxu1 %v1427_v35 }
 0x9fb   :  { %2742 = vmatprep.subr.mxu1 %v3144_v14 }
 0x9fd   :  { %v1583_v46 = vpop.permute.xlu1 %1582 }
 0xa00   :  { %v2959_v36 = vpop.eup %2958 }
 0xa01   :  { %v1343_v37 = vsel %vm516_vm10, %v2959_v36, 0.0  ;;  %v1581_v50 = vpop.permute.xlu1 %1580 }
 0xa02   :  { %1344 = vadd.xlane.f32.xlu0 %v1343_v37 }
 0xa04   :  { %v2961_v38 = vpop.eup %2960 }
 0xa05   :  { %v1340_v41 = vsel %vm516_vm10, %v2961_v38, 0.0 }
 0xa06   :  { %1341 = vadd.xlane.f32.xlu0 %v1340_v41 }
 0xa1c   :  { %1502 = vrot.lane.b32.xlu0 %v3432_v1, %s3155_s0 }
 0xa8f   :  { %v1345_v42 = vpop.xlane.xlu0 %1344 }
 0xa90   :  { %2962 = vrcp.f32 %v1345_v42 }
 0xa93   :  { %v1342_v43 = vpop.xlane.xlu0 %1341 }
 0xa94   :  { %2964 = vrcp.f32 %v1342_v43 }
 0xa97   :  { %v1503_v51 = vpop.permute.xlu0 %1502 }
 0xa9a   :  { %v2963_v45 = vpop.eup %2962 }
 0xa9b   :  { %v1349_v47 = vmul.f32 %v2963_v45, %v2959_v36 }
 0xa9d   :  { %2735 = vmatmul.mubr.msk.f32.vlgmr.msra.gmra.mrb[12].mxu1 %vm516_vm10, %v1349_v47 }
 0xa9e   :  { %v2965_v48 = vpop.eup %2964  ;;  %2743 = vmatpush3.xpose.msk.msra.mxu1 %vm516_vm10, %v1583_v46  ;;  %2744 = vmatprep.mubr.msk.f32.mxu1 %vm3145_vm9, %v3144_v14  ;;  %v2553_v46 = vld [vmem:[%s3696_s11] ss:$0 sm:$0xff] }
 0xa9f   :  { %v1348_v49 = vmul.f32 %v2965_v48, %v2961_v38  ;;  %2752 = vmatprep.subr.mxu1 %v3144_v14 }
 0xaa1   :  { %2730 = vmatmul.mubr.msk.f32.vlgmr.msra.gmra.mrb[12].mxu0 %vm516_vm10, %v1348_v49  ;;  %2745 = vmatmul.mubr.msk.f32.vlgmr.msra.gmra.mrb[14].mxu1 %vm516_vm10, %v1581_v50 }
 0xaa2   :  { %2738 = vmatpush3.xpose.msk.msra.mxu0 %vm516_vm10, %v1505_v44  ;;  %2739 = vmatprep.mubr.msk.f32.mxu0 %vm3145_vm9, %v3144_v14 }
 0xaa3   :  { %2747 = vmatprep.subr.mxu0 %v3144_v14  ;;  %2754 = vmatprep.mubr.msk.f32.mxu1 %vm3145_vm9, %v3144_v14 }
 0xaa5   :  { %2740 = vmatmul.mubr.msk.f32.vlgmr.msra.gmra.mrb[14].mxu0 %vm516_vm10, %v1503_v51 }
 0xaa6   :  { %2749 = vmatprep.mubr.msk.f32.mxu0 %vm3145_vm9, %v3144_v14 }
 0xb70   :  { %v1498_v52 = vpop.f32.mrb[12].mxu1 }
 0xb71   :  { %v2736_v53 = vpop.f32.mrb[13].mxu1 }
 0xb74   :  { %v1422_v54 = vpop.f32.mrb[12].mxu0  ;;  %v1654_v55 = vpop.f32.mrb[14].mxu1 }
 0xb75   :  { %v1655_v56 = vadd.f32 %v3451_v4, %v1654_v55  ;;  %v2731_v57 = vpop.f32.mrb[13].mxu0  ;;  %v2746_v58 = vpop.f32.mrb[15].mxu1 }
 0xb77   :  { %v1661_v59 = vsel %vm516_vm10, %v1655_v56, -inf }
 0xb78   :  { %1662 = vmax.xlane.f32.xlu1 %v1661_v59  ;;  %v1576_v60 = vpop.f32.mrb[14].mxu0 }
 0xb79   :  { %v1577_v61 = vadd.f32 %v3456_v5, %v1576_v60  ;;  %v2741_v62 = vpop.f32.mrb[15].mxu0  ;;  %v2004_v60 = vld [vmem:[#allocation9] sm:$0xff] }
 0xb7b   :  { %v1658_v0 = vsel %vm516_vm10, %v1577_v61, -inf }
 0xb7c   :  { %1659 = vmax.xlane.f32.xlu0 %v1658_v0  ;;  %v2006_v0 = vld [vmem:[#allocation9 + $0x10] sm:$0xff] }
 0xb89   :  { %1680 = vrot.lane.b32.xlu1 %v3432_v1, %s3156_s3 }
 0xb8d   :  { %1834 = vrot.lane.b32.xlu1 %v3524_v16, %s3139_s5 }
 0xb91   :  { %1836 = vrot.lane.b32.xlu1 %v3522_v13, %s3139_s5  ;;  %s3158_s5 = smov 24  }
 0xb95   :  { %1844 = vrot.lane.b32.xlu1 %v1498_v52, %s3157_s25 }
 0xc05   :  { %v1663_v4 = vpop.xlane.xlu1 %1662 }
 0xc06   :  { %v1665_v2 = vsub.f32 %v1655_v56, %v1663_v4  ;;  %v2007_v4 = vld [vmem:[#allocation9 + $0x18] sm:$0xff] }
 0xc08   :  { %v1668_v3 = vmul.f32 1.442695, %v1665_v2  ;;  %v2860_v2 = vpack.c.bf16 %v2007_v4, %v2006_v0 }
 0xc09   :  { %v1681_v6 = vpop.permute.xlu1 %1680  ;;  %v1660_v5 = vpop.xlane.xlu0 %1659 }
 0xc0a   :  { %2966 = vpow2.f32 %v1668_v3  ;;  %v1664_v7 = vsub.f32 %v1577_v61, %v1660_v5  ;;  %2748 = vmatpush3.msra.mxu0 %v1681_v6  ;;  %v2005_v61 = vld [vmem:[#allocation9 + $0x8] sm:$0xff]  ;;  %v2114_v3 = vld [vmem:[#allocation11] sm:$0xff] }
 0xc0b   :  { %v2856_v62 = vpack.c.bf16 %v2005_v61, %v2004_v60  ;;  %v2115_v6 = vld [vmem:[#allocation11 + $0x8] sm:$0xff] }
 0xc0c   :  { %v1666_v8 = vmul.f32 1.442695, %v1664_v7  ;;  %v2864_v5 = vpack.c.bf16 %v2115_v6, %v2114_v3 }
 0xc0d   :  { %v1835_v31 = vpop.permute.xlu1 %1834 }
 0xc0e   :  { %2968 = vpow2.f32 %v1666_v8  ;;  %v1856_v35 = vsel %vm516_vm10, %v3490_v40, %v1835_v31  ;;  %2865 = vmatprep.subr.bf16.mxu0 %v2864_v5  ;;  %v2121_v31 = vld [vmem:[#allocation11 + $0x38] sm:$0xff] }
 0xc11   :  { %v1837_v32 = vpop.permute.xlu1 %1836 }
 0xc12   :  { %v1857_v37 = vsel %vm516_vm10, %v3488_v39, %v1837_v32 }
 0xc14   :  { %v2967_v9 = vpop.eup %2966 }
 0xc15   :  { %v1673_v1 = vsel %vm516_vm10, %v2967_v9, 0.0  ;;  %v1845_v33 = vpop.permute.xlu1 %1844 }
 0xc16   :  { %1674 = vadd.xlane.f32.xlu0 %v1673_v1  ;;  %v1860_v42 = vsel %vm1858_vm11, %v1857_v37, %v1845_v33  ;;  %v2122_v33 = vld [vmem:[#allocation11 + $0x40] sm:$0xff]  ;;  %v2125_v37 = vld [vmem:[#allocation11 + $0x58] sm:$0xff] }
 0xc18   :  { %v2969_v10 = vpop.eup %2968 }
 0xc19   :  { %v1670_v11 = vsel %vm516_vm10, %v2969_v10, 0.0 }
 0xc1a   :  { %1671 = vadd.xlane.f32.xlu0 %v1670_v11 }
 0xc30   :  { %1756 = vrot.lane.b32.xlu0 %v3430_v63, %s3156_s3  ;;  %v1866_v63 = vld [vmem:[#allocation8 + $0x10] sm:$0xff] }
 0xc31   :  { %v2852_v25 = vpack.c.bf16 %v1867_v23, %v1866_v63  ;;  %v2116_v63 = vld [vmem:[#allocation11 + $0x10] sm:$0xff]  ;;  %v2117_v23 = vld [vmem:[#allocation11 + $0x18] sm:$0xff] }
 0xc34   :  { %1842 = vrot.lane.b32.xlu0 %v1422_v54, %s3157_s25 }
 0xca3   :  { %v1675_v12 = vpop.xlane.xlu0 %1674 }
 0xca4   :  { %2970 = vrcp.f32 %v1675_v12 }
 0xca7   :  { %v1672_v13 = vpop.xlane.xlu0 %1671 }
 0xca8   :  { %2972 = vrcp.f32 %v1672_v13  ;;  %v2554_v13 = vld [vmem:[%s3697_s12] ss:$0 sm:$0xff] }
 0xcab   :  { %v1757_v15 = vpop.permute.xlu0 %1756 }
 0xcac   :  { %2753 = vmatpush3.msra.mxu1 %v1757_v15 }
 0xcad   :  { %2849 = vmatprep.subr.bf16.mxu1 %v2848_v22 }
 0xcae   :  { %v2971_v16 = vpop.eup %2970 }
 0xcaf   :  { %v1679_v17 = vmul.f32 %v2971_v16, %v2967_v9  ;;  %v1843_v34 = vpop.permute.xlu0 %1842  ;;  %v2555_v16 = vld [vmem:[%s3698_s13] ss:$0 sm:$0xff] }
 0xcb0   :  { %v1859_v38 = vsel %vm1858_vm11, %v1856_v35, %v1843_v34  ;;  %v2123_v34 = vld [vmem:[#allocation11 + $0x48] sm:$0xff] }
 0xcb1   :  { %2755 = vmatmul.mubr.msk.f32.vlgmr.msra.gmra.mrb[16].mxu1 %vm516_vm10, %v1679_v17  ;;  %v2880_v35 = vpack.c.bf16 %v2123_v34, %v2122_v33 }
 0xcb2   :  { %v2973_v18 = vpop.eup %2972  ;;  %2851 = vmatpush3.bf16.msra.mxu1 %v2848_v22 }
 0xcb3   :  { %v1678_v19 = vmul.f32 %v2973_v18, %v2969_v10  ;;  %2853 = vmatprep.subr.bf16.mxu1 %v2852_v25 }
 0xcb5   :  { %2750 = vmatmul.mubr.msk.f32.vlgmr.msra.gmra.mrb[16].mxu0 %vm516_vm10, %v1678_v19 }
 0xcb6   :  { %2855 = vmatpush3.bf16.msra.mxu1 %v2852_v25  ;;  %2867 = vmatpush3.bf16.msra.mxu0 %v2864_v5  ;;  %v2868_v25 = vpack.c.bf16 %v2117_v23, %v2116_v63 }
 0xcb7   :  { %2857 = vmatprep.subr.bf16.mxu1 %v2856_v62 }
 0xcb8   :  { %2869 = vmatprep.subr.bf16.mxu0 %v2868_v25 }
 0xcba   :  { %2871 = vmatpush3.bf16.msra.mxu0 %v2868_v25 }
 0xd84   :  { %v1828_v27 = vpop.f32.mrb[16].mxu1 }
 0xd85   :  { %1852 = vrot.lane.b32.xlu1 %v1828_v27, %s3158_s5  ;;  %v2756_v28 = vpop.f32.mrb[17].mxu1  ;;  %v2118_v27 = vld [vmem:[#allocation11 + $0x20] sm:$0xff] }
 0xd86   :  { %v2119_v28 = vld [vmem:[#allocation11 + $0x28] sm:$0xff] }
 0xd88   :  { %v1752_v29 = vpop.f32.mrb[16].mxu0 }
 0xd89   :  { %1850 = vrot.lane.b32.xlu0 %v1752_v29, %s3158_s5  ;;  %v2751_v30 = vpop.f32.mrb[17].mxu0  ;;  %v2872_v29 = vpack.c.bf16 %v2119_v28, %v2118_v27 }
 0xd8a   :  { %v2120_v30 = vld [vmem:[#allocation11 + $0x30] sm:$0xff] }
 0xd8b   :  { %2873 = vmatprep.subr.bf16.mxu0 %v2872_v29  ;;  %v2876_v32 = vpack.c.bf16 %v2121_v31, %v2120_v30 }
 0xd8c   :  { %2875 = vmatpush3.bf16.msra.mxu0 %v2872_v29 }
 0xd8d   :  { %2877 = vmatprep.subr.bf16.mxu0 %v2876_v32 }
 0xd90   :  { %2879 = vmatpush3.bf16.msra.mxu0 %v2876_v32 }
 0xd91   :  { %2881 = vmatprep.subr.bf16.mxu0 %v2880_v35 }
 0xd94   :  { %2883 = vmatpush3.bf16.msra.mxu0 %v2880_v35 }
 0xdf7   :  { %v1853_v36 = vpop.permute.xlu1 %1852 }
 0xdf8   :  { %v1863_v44 = vsel %vm1861_vm12, %v1860_v42, %v1853_v36  ;;  %v2124_v36 = vld [vmem:[#allocation11 + $0x50] sm:$0xff]  ;;  %v2127_v42 = vld [vmem:[#allocation11 + $0x68] sm:$0xff] }
 0xdfb   :  { %v1851_v41 = vpop.permute.xlu0 %1850 }
 0xdfc   :  { %v1862_v43 = vsel %vm1861_vm12, %v1859_v38, %v1851_v41  ;;  %v2884_v38 = vpack.c.bf16 %v2125_v37, %v2124_v36  ;;  %v2126_v41 = vld [vmem:[#allocation11 + $0x60] sm:$0xff] }
 0xdfd   :  { %2765 = vmatprep.mubr.msk.f32.mxu1 %vm377_vm8, %v1862_v43  ;;  %v2888_v43 = vpack.c.bf16 %v2127_v42, %v2126_v41 }
 0xdfe   :  { %2766 = vmatmul.mubr.msk.f32.vlgmr.msra.gmra.mrb[18].mxu1 %vm377_vm8, %v1863_v44  ;;  %2885 = vmatprep.subr.bf16.mxu0 %v2884_v38  ;;  %v2128_v44 = vld [vmem:[#allocation11 + $0x70] sm:$0xff] }
 0xdff   :  { %2859 = vmatpush3.bf16.msra.mxu1 %v2856_v62  ;;  %2887 = vmatpush3.bf16.msra.mxu0 %v2884_v38 }
 0xe00   :  { %2861 = vmatprep.subr.bf16.mxu1 %v2860_v2  ;;  %2889 = vmatprep.subr.bf16.mxu0 %v2888_v43 }
 0xe03   :  { %2863 = vmatpush3.bf16.msra.mxu1 %v2860_v2  ;;  %2891 = vmatpush3.bf16.msra.mxu0 %v2888_v43 }
 0xed1   :  { %v2767_v45 = vpop.f32.mrb[18].mxu1 }
 0xed2   :  { %v1950_v40 = vadd.f32 %v2767_v45, %v3402_v24  ;;  %v1940_v47 = vpop.f32.mrb[19].mxu1  ;;  %v2129_v45 = vld [vmem:[#allocation11 + $0x78] sm:$0xff] }
 0xed3   :  { %v1949_v48 = vadd.f32 %v1940_v47, %v3404_v26 }
 0xed4   :  { %v3581_v39 = vadd.f32 %v2553_v46, %v1950_v40  ;;  %v2556_v40 = vld [vmem:[%s3700_s15] ss:$0 sm:$0xff] }
 0xed5   :  { %v3583_v49 = vadd.f32 %v2553_v46, %v1949_v48  ;;  %v2892_v46 = vpack.c.bf16 %v2129_v45, %v2128_v44 }
 0xed6   :  { %v1965_v50 = vsel %vm377_vm8, %v3581_v39, 0.0 }
 0xed7   :  { %1966 = vadd.xlane.f32.xlu1 %v1965_v50  ;;  %v1962_v51 = vsel %vm377_vm8, %v3583_v49, 0.0  ;;  %2893 = vmatprep.subr.bf16.mxu0 %v2892_v46 }
 0xed8   :  { %1963 = vadd.xlane.f32.xlu0 %v1962_v51  ;;  %2895 = vmatpush3.bf16.msra.mxu0 %v2892_v46 }
 0xf64   :  { %v1967_v52 = vpop.xlane.xlu1 %1966 }
 0xf65   :  { %v1969_v53 = vmul.f32 0.03125, %v1967_v52  ;;  %v1964_v54 = vpop.xlane.xlu0 %1963 }
 0xf66   :  { %v1968_v55 = vmul.f32 0.03125, %v1964_v54 }
 0xf67   :  { %v1971_v24 = vsub.f32 %v3581_v39, %v1969_v53 }
 0xf68   :  { %v1970_v26 = vsub.f32 %v3583_v49, %v1968_v55 }
 0xf69   :  { %v1973_v58 = vmul.f32 %v1971_v24, %v1971_v24 }
 0xf6a   :  { %v1972_v56 = vmul.f32 %v1970_v26, %v1970_v26 }
 0xf6b   :  { %v1977_v59 = vsel %vm377_vm8, %v1973_v58, 0.0 }
 0xf6c   :  { %v1974_v57 = vsel %vm377_vm8, %v1972_v56, 0.0 }
 0xf6d   :  { %1975 = vadd.xlane.f32.xlu0 %v1974_v57 }
 0xf71   :  { %1978 = vadd.xlane.f32.xlu0 %v1977_v59 }
 0xffa   :  { %v1976_v7 = vpop.xlane.xlu0 %1975 }
 0xffb   :  { %v1980_v8 = vmul.f32 0.03125, %v1976_v7  ;;  %v2559_v7 = vld [vmem:[%s3702_s17] ss:$0 sm:$0xff] }
 0xffd   :  { %v1982_v9 = vadd.f32 1e-06, %v1980_v8 }
 0xffe   :  { %v1979_v1 = vpop.xlane.xlu0 %1978 }
 0xfff   :  { %2974 = vrsqrt.f32 %v1982_v9  ;;  %v1981_v10 = vmul.f32 0.03125, %v1979_v1 }
0x1001   :  { %v1983_v11 = vadd.f32 1e-06, %v1981_v10  ;;  %v2560_v10 = vld [vmem:[%s3703_s18] ss:$0 sm:$0xff] }
0x1003   :  { %2976 = vrsqrt.f32 %v1983_v11 }
0x1009   :  { %v2975_v12 = vpop.eup %2974 }
0x100a   :  { %v1986_v15 = vmul.f32 %v2975_v12, %v1970_v26 }
0x100c   :  { %v1994_v17 = vmul.f32 %v2554_v13, %v1986_v15 }
0x100d   :  { %v2977_v18 = vpop.eup %2976 }
0x100e   :  { %v1987_v19 = vmul.f32 %v2977_v18, %v1971_v24  ;;  %v2002_v20 = vadd.f32 %v2555_v16, %v1994_v17  ;;  %v2995_v17 = vld [vmem:[%s3729_s19] sm:$0xff] }
0x100f   :  { %vm371_vm14 = vcmp.gt.s32.totalorder %v2995_v17, 0  ;;  %v2561_v18 = vld [vmem:[#allocation2] ss:$0 sm:$0xff] }
0x1010   :  { %v1995_v21 = vmul.f32 %v2554_v13, %v1987_v19  ;;  %2776 = vmatprep.mubr.msk.f32.mxu1 %vm377_vm8, %v2002_v20  ;;  %v3159_v19 = vmov -1e+09  }
0x1012   :  { %v2003_v22 = vadd.f32 %v2555_v16, %v1995_v21 }
0x1014   :  { %2777 = vmatmul.mubr.msk.f32.vlgmr.msra.gmra.mrb[20].mxu1 %vm377_vm8, %v2003_v22  ;;  %v373_v22 = vsel %vm371_vm14, 0.0, %v3159_v19 }
0x1015   :  { %2822 = vmatprep.mubr.msk.f32.mxu1 %vm3145_vm9, %v3144_v14 }
0x10e7   :  { %v2778_v47 = vpop.f32.mrb[20].mxu1 }
0x10e8   :  { %v2093_v48 = vadd.f32 %v2778_v47, %v2556_v40  ;;  %v2087_v50 = vpop.f32.mrb[21].mxu1 }
0x10e9   :  { %v2088_v51 = vadd.f32 %v2556_v40, %v2087_v50 }
0x10ea   :  { %v2099_v52 = vmul.f32 0.044715, %v2093_v48  ;;  %v2097_v2 = vmul.f32 0.5, %v2093_v48 }
0x10eb   :  { %v2098_v53 = vmul.f32 0.044715, %v2088_v51  ;;  %v2096_v0 = vmul.f32 0.5, %v2088_v51 }
0x10ec   :  { %v2101_v54 = vmul.f32 %v2099_v52, %v2093_v48 }
0x10ed   :  { %v2100_v55 = vmul.f32 %v2098_v53, %v2088_v51 }
0x10ee   :  { %v2103_v24 = vmul.f32 %v2101_v54, %v2093_v48 }
0x10ef   :  { %v2102_v26 = vmul.f32 %v2100_v55, %v2088_v51 }
0x10f0   :  { %v2105_v56 = vadd.f32 %v2103_v24, %v2093_v48 }
0x10f1   :  { %v2104_v57 = vadd.f32 %v2102_v26, %v2088_v51 }
0x10f2   :  { %v2107_v58 = vmul.f32 0.7978846, %v2105_v56 }
0x10f3   :  { %v2106_v59 = vmul.f32 0.7978846, %v2104_v57 }
0x10f4   :  { %2978 = vtanh.f32 %v2107_v58 }
0x10f5   :  { %2980 = vtanh.f32 %v2106_v59 }
0x10fe   :  { %v2979_v60 = vpop.eup %2978 }
0x10ff   :  { %v2981_v61 = vpop.eup %2980  ;;  %v2111_v62 = vadd.f32 1.0, %v2979_v60 }
0x1100   :  { %v2110_v4 = vadd.f32 1.0, %v2981_v61 }
0x1101   :  { %v2113_v6 = vmul.f32 %v2111_v62, %v2097_v2 }
0x1102   :  { %v2112_v3 = vmul.f32 %v2110_v4, %v2096_v0 }
0x1104   :  { %2811 = vmatprep.mubr.f32.mxu0 %v2112_v3 }
0x1105   :  { %2812 = vmatmul.mubr.f32.vlgmr.msra.gmra.mrb[18].mxu0 %v2113_v6  ;;  %v2307_v6 = vld [vmem:[%s3705_s20] sm:$0xff] }
0x11d8   :  { %v2813_v5 = vpop.f32.mrb[18].mxu0 }
0x11d9   :  { %v2206_v8 = vadd.f32 %v2813_v5, %v3581_v39  ;;  %v2196_v9 = vpop.f32.mrb[19].mxu0  ;;  %v2308_v5 = vld [vmem:[%s3705_s20 + $0x8] sm:$0xff] }
0x11da   :  { %v2205_v1 = vadd.f32 %v2196_v9, %v3583_v49  ;;  %v2994_v49 = vld [vmem:[%s3729_s19 + $0x8] sm:$0xff]  ;;  %v2309_v9 = vld [vmem:[%s3705_s20 + $0x10] sm:$0xff] }
0x11db   :  { %v3614_v11 = vadd.f32 %v2559_v7, %v2206_v8  ;;  %vm372_vm13 = vcmp.gt.s32.totalorder %v2994_v49, 0  ;;  %v3160_v8 = vmov 0.0|0.0  }
0x11dc   :  { %v3616_v12 = vadd.f32 %v2559_v7, %v2205_v1  ;;  %v374_v20 = vsel %vm372_vm13, 0.0, %v3159_v19  ;;  %v2897_v7 = vpack.c.bf16 %v2308_v5, %v2307_v6  ;;  %2896 = vmatprep.subr.bf16.mxu1 %v3160_v8  ;;  %v2310_v1 = vld [vmem:[%s3705_s20 + $0x18] sm:$0xff] }
0x11dd   :  { %v2224_v13 = vmul.f32 %v2560_v10, %v3614_v11 }
0x11de   :  { %v2223_v15 = vmul.f32 %v2560_v10, %v3616_v12  ;;  %2898 = vmatpush3.bf16.msra.mxu1 %v2897_v7  ;;  %v2900_v10 = vpack.c.bf16 %v2310_v1, %v2309_v9 }
0x11df   :  { %v2228_v16 = vsel %vm377_vm8, %v2224_v13, 0.0  ;;  %2899 = vmatprep.subr.bf16.mxu1 %v3160_v8 }
0x11e0   :  { %2229 = vadd.xlane.f32.xlu0 %v2228_v16  ;;  %v2225_v39 = vsel %vm377_vm8, %v2223_v15, 0.0 }
0x11e1   :  { %2226 = vadd.xlane.f32.xlu1 %v2225_v39 }
0x11e2   :  { %2901 = vmatpush3.bf16.msra.mxu1 %v2900_v10 }
0x11e3   :  { %2902 = vmatprep.subr.bf16.mxu1 %v3160_v8 }
0x126d   :  { %v2230_v21 = vpop.xlane.xlu0 %2229 }
0x126e   :  { %v2239_v63 = vadd.f32 %v2561_v18, %v2230_v21  ;;  %v2227_v23 = vpop.xlane.xlu1 %2226 }
0x126f   :  { %v2238_v25 = vadd.f32 %v2561_v18, %v2227_v23 }
0x1270   :  { %v2241_v27 = vadd.f32 %v2239_v63, %v374_v20 }
0x1271   :  { %v2240_v28 = vadd.f32 %v2238_v25, %v373_v22 }
0x1272   :  { %v2250_v29 = vsel %vm2242_vm15, %v2241_v27, -inf }
0x1273   :  { %v2251_v30 = vrot.slane %v2250_v29, 4  ;;  %v2243_v31 = vsel %vm2242_vm15, %v2240_v28, -inf }
0x1274   :  { %v2244_v32 = vrot.slane %v2243_v31, 4 }
0x1275   :  { %v2252_v33 = vmax.f32 %v2250_v29, %v2251_v30 }
0x1276   :  { %v2245_v34 = vmax.f32 %v2243_v31, %v2244_v32 }
0x1277   :  { %v2253_v35 = vrot.slane %v2252_v33, 2 }
0x1278   :  { %v2246_v36 = vrot.slane %v2245_v34, 2 }
0x1279   :  { %v2254_v37 = vmax.f32 %v2252_v33, %v2253_v35  ;;  %v2397_v33 = vld [vmem:[%s3707_s22 + $0x10] sm:$0xff] }
0x127a   :  { %v2247_v38 = vmax.f32 %v2245_v34, %v2246_v36  ;;  %v2398_v34 = vld [vmem:[%s3707_s22 + $0x18] sm:$0xff]  ;;  %v2562_v36 = vld [vmem:[%s3706_s21] ss:$0 sm:$0xff]  ;;  %s3161_s21 = smov [#allocation12]  }
0x127b   :  { %v2255_v41 = vrot.slane %v2254_v37, 1  ;;  %v2906_v35 = vpack.c.bf16 %v2398_v34, %v2397_v33 }
0x127c   :  { %v2248_v42 = vrot.slane %v2247_v38, 1 }
0x127d   :  { %v2256_v43 = vmax.f32 %v2254_v37, %v2255_v41 }
0x127e   :  { %v2249_v44 = vmax.f32 %v2247_v38, %v2248_v42 }
0x127f   :  { %v2258_v45 = vsub.f32 %v2241_v27, %v2256_v43 }
0x1280   :  { %v2257_v46 = vsub.f32 %v2240_v28, %v2249_v44 }
0x1281   :  { %v2261_v40 = vmul.f32 1.442695, %v2258_v45 }
0x1282   :  { %v2259_v47 = vmul.f32 1.442695, %v2257_v46 }
0x1283   :  { %2982 = vpow2.f32 %v2261_v40 }
0x1284   :  { %2984 = vpow2.f32 %v2259_v47 }
0x128d   :  { %v2983_v48 = vpop.eup %2982 }
0x128e   :  { %v2985_v50 = vpop.eup %2984  ;;  %v2270_v51 = vsel %vm2242_vm15, %v2983_v48, 0.0 }
0x128f   :  { %v2271_v52 = vrot.slane %v2270_v51, 4  ;;  %v2263_v53 = vsel %vm2242_vm15, %v2985_v50, 0.0 }
0x1290   :  { %v2264_v54 = vrot.slane %v2263_v53, 4 }
0x1291   :  { %v2272_v55 = vadd.f32 %v2271_v52, %v2270_v51 }
0x1292   :  { %v2265_v24 = vadd.f32 %v2264_v54, %v2263_v53 }
0x1293   :  { %v2273_v26 = vrot.slane %v2272_v55, 2 }
0x1294   :  { %v2266_v56 = vrot.slane %v2265_v24, 2 }
0x1295   :  { %v2274_v57 = vadd.f32 %v2273_v26, %v2272_v55 }
0x1296   :  { %v2267_v58 = vadd.f32 %v2266_v56, %v2265_v24 }
0x1297   :  { %v2275_v59 = vrot.slane %v2274_v57, 1 }
0x1298   :  { %v2268_v60 = vrot.slane %v2267_v58, 1 }
0x1299   :  { %v2276_v61 = vadd.f32 %v2275_v59, %v2274_v57 }
0x129a   :  { %v2269_v62 = vadd.f32 %v2268_v60, %v2267_v58 }
0x129b   :  { %2986 = vrcp.f32 %v2276_v61 }
0x129c   :  { %2988 = vrcp.f32 %v2269_v62 }
0x12a5   :  { %v2987_v0 = vpop.eup %2986 }
0x12a6   :  { %v2989_v4 = vpop.eup %2988  ;;  %v2280_v2 = vmul.f32 %v2987_v0, %v2983_v48 }
0x12a7   :  { %v2279_v3 = vmul.f32 %v2989_v4, %v2985_v50 }
0x12a8   :  { %2288 = vperm.xlu0 %2936, %v2280_v2  }
0x12a9   :  { %2283 = vperm.xlu1 %2937, %v2279_v3  }
0x1327   :  { %v2289_v13 = vpop.permute.xlu0 %2288 }
0x1328   :  { %v2292_v15 = vmul.f32 %v2289_v13, %v3614_v11  ;;  %v2284_v16 = vpop.permute.xlu1 %2283  ;;  %v2395_v11 = vld [vmem:[%s3707_s22] sm:$0xff] }
0x1329   :  { %v2291_v39 = vmul.f32 %v2284_v16, %v3616_v12  ;;  %v2396_v12 = vld [vmem:[%s3707_s22 + $0x8] sm:$0xff]  ;;  %s2499_s22 = sshll.u32 %s3161_s21, 4  ;;  %s2500_s22 = int_to_ptr.vmem [resolvable:$true] %s2499_s22 }
0x132a   :  { %v2300_v49 = vsel %vm377_vm8, %v2292_v15, 0.0  ;;  %v2903_v31 = vpack.c.bf16 %v2396_v12, %v2395_v11  ;;  %p3111_p13 = scmp.lt.s32.totalorder %s2500_s22, %s2500_s22 }
0x132b   :  { %v2301_v17 = vrot.slane %v2300_v49, 4  ;;  %v2293_v18 = vsel %vm377_vm8, %v2291_v39, 0.0 }
0x132c   :  { %v2294_v19 = vrot.slane %v2293_v18, 4 }
0x132d   :  { %v2302_v20 = vadd.f32 %v2301_v17, %v2300_v49 }
0x132e   :  { %v2295_v21 = vadd.f32 %v2294_v19, %v2293_v18 }
0x132f   :  { %v2303_v22 = vrot.slane %v2302_v20, 2 }
0x1330   :  { %v2296_v63 = vrot.slane %v2295_v21, 2 }
0x1331   :  { %v2304_v23 = vadd.f32 %v2303_v22, %v2302_v20 }
0x1332   :  { %v2297_v25 = vadd.f32 %v2296_v63, %v2295_v21 }
0x1333   :  { %v2305_v27 = vrot.slane %v2304_v23, 1 }
0x1334   :  { %v2298_v28 = vrot.slane %v2297_v25, 1 }
0x1335   :  { %v2306_v29 = vadd.f32 %v2305_v27, %v2304_v23 }
0x1336   :  { %v2299_v30 = vadd.f32 %v2298_v28, %v2297_v25 }
0x1338   :  { %v2321_v32 = vsel %vm2320_vm0, %v2306_v29, %v2299_v30 }
0x1339   :  { %2823 = vmatmul.mubr.msk.f32.vlgmr.msra.gmra.mrb[22].mxu1 %vm377_vm8, %v2321_v32 }
0x133a   :  { %2904 = vmatpush3.bf16.msra.mxu1 %v2903_v31  ;;  %2833 = vmatprep.mubr.msk.f32.mxu1 %vm3145_vm9, %v3144_v14  ;;  %v2564_v14 = vld [vmem:[%s3708_s23] ss:$0 sm:$0xff]  ;;  %s3106_s23 = scalar_lea.vmem %s2500_s22, 32 }
0x133b   :  { %2905 = vmatprep.subr.bf16.mxu1 %v3160_v8  ;;  %p3107_p12 = scmp.ne.s32.totalorder %s2500_s22, %s3106_s23  ;;  %p3112_p0 = scmp.lt.s32.totalorder %s3106_s23, %s3106_s23 }
0x133d   :  { %p3113_p1 = por %p3112_p0, %p3111_p13 }
0x133e   :  { %2907 = vmatpush3.bf16.msra.mxu1 %v2906_v35 }
0x133f   :  { %p3114_p2 = pnand %p3113_p1, %p3107_p12 }
0x140c   :  { %v2390_v37 = vpop.f32.mrb[22].mxu1 }
0x140d   :  { %v2391_v38 = vadd.f32 %v2562_v36, %v2390_v37  ;;  %v2824_v41 = vpop.f32.mrb[23].mxu1 }
0x140f   :  { %v2394_v42 = vmax.f32 %v2391_v38, 0.0 }
0x1411   :  { %2834 = vmatmul.mubr.msk.f32.vlgmr.msra.gmra.mrb[24].mxu1 %vm377_vm8, %v2394_v42 }
0x14e4   :  { %v2475_v43 = vpop.f32.mrb[24].mxu1 }
0x14e5   :  { %v2476_v44 = vadd.f32 %v2564_v14, %v2475_v43  ;;  %v2835_v45 = vpop.f32.mrb[25].mxu1 }
0x14e7   :  { %v2480_v46 = vsel %vm2479_vm1, %v2476_v44, -inf }
0x14e8   :  { %2481 = vmax.xlane.f32.xlu1 %v2480_v46 }
0x1575   :  { %v2482_v40 = vpop.xlane.xlu1 %2481 }
0x1576   :  { %v2483_v47 = vsub.f32 %v2476_v44, %v2482_v40 }
0x1578   :  { %v2484_v48 = vmul.f32 1.442695, %v2483_v47 }
0x157a   :  { %2990 = vpow2.f32 %v2484_v48 }
0x1584   :  { %v2991_v50 = vpop.eup %2990 }
0x1585   :  { %v2486_v51 = vsel %vm2479_vm1, %v2991_v50, 0.0 }
0x1586   :  { %2487 = vadd.xlane.f32.xlu0 %v2486_v51 }
0x1613   :  { %v2488_v52 = vpop.xlane.xlu0 %2487 }
0x1614   :  { %2992 = vlog2.f32 %v2488_v52 }
0x161e   :  { %v2993_v53 = vpop.eup %2992 }
0x161f   :  { %v2490_v54 = vmul.f32 0.6931472, %v2993_v53 }
0x1621   :  { %v2491_v55 = vsub.f32 %v2483_v47, %v2490_v54 }
0x1623   :  { %2492 = vst.msk [vmem:[#allocation12] sm:$0x3] %vm2479_vm1, %v2491_v55 }
0x1624   :  { %3117 = shalt.err (!%p3114_p2)
}
0x1625   :  { %s3735_s14 = sld [smem:[#allocation26_spill]] }
0x162b   :  { %s3118_s2 = scalar_lea.hbm %s3735_s14, 32 }
0x162c   :  { %p3119_p3 = scmp.ne.s32.totalorder %s3735_s14, %s3118_s2  ;;  %p3122_p4 = scmp.lt.u32.totalorder %s3118_s2, %s3735_s14 }
0x162e   :  { %p3124_p5 = pnand %p3122_p4, %p3119_p3 }
0x1630   :  { %3127 = shalt.err (!%p3124_p5)
}
0x1631   :  { %2502 = dma.vmem_to_hbm [thread:$0]  %s2500_s22, 32, %s3735_s14, [#allocation5]  }
0x1632   :  { %3134 = dma.done.wait [#allocation5], 32  }
0x1633   :  { %3135 = vsyncadd [#allocation5], 4294967264 }
0x1634   :  { %2506 = vsyncpa [#allocation4], 1 }
0x1635   :  { %2507 = vsyncpa [#allocation7], 1 }
0x1636   :  { %2508 = vsyncpa [#allocation10], 1 }
0x1637   :  { %2509 = vsyncpa [#allocation5], 1 }

</bundles_post_ra>
